<compile_context>
chip_gen: v7x
topology: tpu7x:2x2x1
jax: 0.10.0
libtpu: 0.0.40
codegen_flags: <defaults>
</compile_context>

<pallas_src>
import functools

import jax
import jax.numpy as jnp
from jax import lax
from jax.experimental import pallas as pl


# ----------------------------------------------------------------------------
# Fused kernel
# ----------------------------------------------------------------------------
def _lstm_cell(xproj, h_prev, c_prev, whh, hidden, g_mask):
    """One LSTM cell step; PyTorch gate order [i, f, g, o]."""
    gates = xproj + jnp.dot(h_prev, whh, preferred_element_type=jnp.float32)  # (B, 4H)
    # Full-vreg sigmoid/tanh (EUP) combined via a lane mask instead of four
    # H-lane sliced activations.
    act = jnp.where(g_mask, jnp.tanh(gates), jax.nn.sigmoid(gates))
    i_g = act[:, 0 * hidden:1 * hidden]
    f_g = act[:, 1 * hidden:2 * hidden]
    g_g = act[:, 2 * hidden:3 * hidden]
    o_g = act[:, 3 * hidden:4 * hidden]
    c_new = f_g * c_prev + i_g * g_g
    h_new = o_g * jnp.tanh(c_new)
    return h_new, c_new


def _fused_kernel(x_ref,
                  wih0f_ref, whh0f_ref, b0f_ref,
                  wih0b_ref, whh0b_ref, b0b_ref,
                  wih1f_ref, whh1f_ref, b1f_ref,
                  wih1b_ref, whh1b_ref, b1b_ref,
                  w1_ref, b1_ref, w2_ref, b2_ref, w3_ref, b3_ref,
                  out_ref, *, seq_len, batch):
    T, B = seq_len, batch
    H = whh0f_ref.shape[0]
    f32 = jnp.float32

    lane = lax.broadcasted_iota(jnp.int32, (B, 4 * H), 1)
    g_mask = (lane >= 2 * H) & (lane < 3 * H)          # tanh lanes (g gate)
    zeros_bh = jnp.zeros((B, H), f32)

    # ---------------- Layer 0 ----------------
    # Hoisted input projections: one matmul per direction over all timesteps.
    x_flat = x_ref[...]                                                   # (T*B, D_in)
    xp0f = (jnp.dot(x_flat, wih0f_ref[...], preferred_element_type=f32)
            + b0f_ref[...])                                               # (T*B, 4H)
    xp0b = (jnp.dot(x_flat, wih0b_ref[...], preferred_element_type=f32)
            + b0b_ref[...])

    whh0f = whh0f_ref[...]
    whh0b = whh0b_ref[...]

    h_f = c_f = zeros_bh
    h_b = c_b = zeros_bh
    hs_f = [None] * T     # forward hidden at output time t
    hs_b = [None] * T     # backward hidden at output time t
    # Fully unrolled time loop; forward and backward steps interleaved so the
    # two independent dependence chains can be co-scheduled.
    for s in range(T):
        tb = T - 1 - s
        h_f, c_f = _lstm_cell(xp0f[s * B:(s + 1) * B], h_f, c_f, whh0f, H, g_mask)
        h_b, c_b = _lstm_cell(xp0b[tb * B:(tb + 1) * B], h_b, c_b, whh0b, H, g_mask)
        hs_f[s] = h_f
        hs_b[tb] = h_b

    # ---------------- Layer 1 ----------------
    Hf = jnp.concatenate(hs_f, axis=0)                                    # (T*B, H)
    Hb = jnp.concatenate(hs_b, axis=0)                                    # (T*B, H)

    wih1f = wih1f_ref[...]                                                # (2H, 4H)
    xp1f = (jnp.dot(Hf, wih1f[:H], preferred_element_type=f32)
            + jnp.dot(Hb, wih1f[H:], preferred_element_type=f32)
            + b1f_ref[...])                                               # (T*B, 4H)

    whh1f = whh1f_ref[...]
    h1f = c1f = zeros_bh
    for s in range(T):
        h1f, c1f = _lstm_cell(xp1f[s * B:(s + 1) * B], h1f, c1f, whh1f, H, g_mask)

    # Backward direction of layer 1: out[:, -1, H:] is the backward hidden
    # after processing only the last timestep -> a single cell step from zeros.
    wih1b = wih1b_ref[...]
    xp1b_last = (jnp.dot(hs_f[T - 1], wih1b[:H], preferred_element_type=f32)
                 + jnp.dot(hs_b[T - 1], wih1b[H:], preferred_element_type=f32)
                 + b1b_ref[...])                                          # (B, 4H)
    h1b, _ = _lstm_cell(xp1b_last, zeros_bh, zeros_bh, whh1b_ref[...], H, g_mask)

    # ------- Head: fc1 -> BN1(folded) -> relu -> fc2 -> BN2(folded) -> relu -> fc3
    # TODO(synk): nn.Dropout is identity in eval mode; training-mode dropout not modeled.
    w1 = w1_ref[...]                                                      # (2H, H), BN1 folded
    y = (jnp.dot(h1f, w1[:H], preferred_element_type=f32)
         + jnp.dot(h1b, w1[H:], preferred_element_type=f32)
         + b1_ref[...])
    y = jnp.maximum(y, 0.0)
    y = jnp.dot(y, w2_ref[...], preferred_element_type=f32) + b2_ref[...]
    y = jnp.maximum(y, 0.0)
    out_ref[...] = (jnp.dot(y, w3_ref[...], preferred_element_type=f32)
                    + b3_ref[...])                                        # (B, 128) lane-padded


# ----------------------------------------------------------------------------
# Wrapper
# ----------------------------------------------------------------------------
def _fold_bn(w_t, b, gamma, beta, mean, var, eps=1e-5):
    # Eval-mode BatchNorm1d folded into the preceding linear layer.
    scale = gamma * lax.rsqrt(var + eps)        # (1, out)
    return w_t * scale, (b - mean) * scale + beta


@jax.jit
def air_quality_lstm_forward(x_btd, params):
    """x_btd: (B, T, input_size), batch_first as in PyTorch. Returns (B, 1)."""
    assert len(params["lstm"]) == 2, "fused kernel implements num_layers == 2"
    B, T, D_in = x_btd.shape

    # (B, T, D) -> time-major flat (T*B, D); rows [t*B:(t+1)*B] = timestep t.
    x_flat = jnp.transpose(x_btd, (1, 0, 2)).reshape(T * B, D_in).astype(jnp.float32)

    l0f, l0b = params["lstm"][0]
    l1f, l1b = params["lstm"][1]
    hd = params["head"]

    # Fold eval-mode BatchNorm1d (running stats) into fc1 / fc2.
    w1, b1 = _fold_bn(hd["w1"], hd["b1"], hd["g1"], hd["be1"], hd["m1"], hd["v1"])
    w2, b2 = _fold_bn(hd["w2"], hd["b2"], hd["g2"], hd["be2"], hd["m2"], hd["v2"])
    # Pad fc3 to 128 output lanes so the final store inside the kernel is lane-dense.
    pad = 128 - hd["w3"].shape[1]
    w3 = jnp.pad(hd["w3"], ((0, 0), (0, pad)))
    b3 = jnp.pad(hd["b3"], ((0, 0), (0, pad)))

    kernel = functools.partial(_fused_kernel, seq_len=T, batch=B)
    out_padded = pl.pallas_call(
        kernel,
        out_shape=jax.ShapeDtypeStruct((B, 128), jnp.float32),
    )(x_flat,
      l0f["wih_t"], l0f["whh_t"], l0f["bias"],
      l0b["wih_t"], l0b["whh_t"], l0b["bias"],
      l1f["wih_t"], l1f["whh_t"], l1f["bias"],
      l1b["wih_t"], l1b["whh_t"], l1b["bias"],
      w1, b1, w2, b2, w3, b3)
    return out_padded[:, :1]


# ----------------------------------------------------------------------------
# Parameter construction (deterministic, PyTorch-shaped)
# ----------------------------------------------------------------------------
def init_params(key, input_size, hidden_size, num_layers):
    k_lstm = 1.0 / jnp.sqrt(hidden_size)
    params = {"lstm": []}
    for layer in range(num_layers):
        in_dim = input_size if layer == 0 else 2 * hidden_size
        dirs = []
        for _ in range(2):  # forward, backward
            key, k1, k2, k3, k4 = jax.random.split(key, 5)
            w_ih = jax.random.uniform(k1, (4 * hidden_size, in_dim),
                                      minval=-k_lstm, maxval=k_lstm, dtype=jnp.float32)
            w_hh = jax.random.uniform(k2, (4 * hidden_size, hidden_size),
                                      minval=-k_lstm, maxval=k_lstm, dtype=jnp.float32)
            b_ih = jax.random.uniform(k3, (4 * hidden_size,),
                                      minval=-k_lstm, maxval=k_lstm, dtype=jnp.float32)
            b_hh = jax.random.uniform(k4, (4 * hidden_size,),
                                      minval=-k_lstm, maxval=k_lstm, dtype=jnp.float32)
            dirs.append({
                "wih_t": w_ih.T,                               # (in_dim, 4H)
                "whh_t": w_hh.T,                               # (H, 4H)
                "bias": (b_ih + b_hh).reshape(1, 4 * hidden_size),
            })
        params["lstm"].append(dirs)

    def linear(key, out_f, in_f):
        k = 1.0 / jnp.sqrt(in_f)
        key, kw, kb = jax.random.split(key, 3)
        w = jax.random.uniform(kw, (out_f, in_f), minval=-k, maxval=k, dtype=jnp.float32)
        b = jax.random.uniform(kb, (out_f,), minval=-k, maxval=k, dtype=jnp.float32)
        return key, w.T, b.reshape(1, out_f)

    H = hidden_size
    key, w1, b1 = linear(key, H, 2 * H)
    key, w2, b2 = linear(key, H // 2, H)
    key, w3, b3 = linear(key, 1, H // 2)
    params["head"] = {
        "w1": w1, "b1": b1,
        "g1": jnp.ones((1, H), jnp.float32), "be1": jnp.zeros((1, H), jnp.float32),
        "m1": jnp.zeros((1, H), jnp.float32), "v1": jnp.ones((1, H), jnp.float32),
        "w2": w2, "b2": b2,
        "g2": jnp.ones((1, H // 2), jnp.float32), "be2": jnp.zeros((1, H // 2), jnp.float32),
        "m2": jnp.zeros((1, H // 2), jnp.float32), "v2": jnp.ones((1, H // 2), jnp.float32),
        "w3": w3, "b3": b3,
    }
    return params


if __name__ == "__main__":
    INPUT_SIZE = 4
    HIDDEN = 32
    NUM_LAYERS = 2
    B, T = 2, 8

    key = jax.random.PRNGKey(0)
    key, kx = jax.random.split(key)
    x = jax.random.normal(kx, (B, T, INPUT_SIZE), dtype=jnp.float32)

    params = init_params(key, INPUT_SIZE, HIDDEN, NUM_LAYERS)

    out = air_quality_lstm_forward(x, params)
    jax.block_until_ready(out)
    assert out.shape == (B, 1), out.shape
    print("KERNEL_OK")
</pallas_src>

<mosaic_0001>
module attributes {stable_mosaic.version = 11 : i64} {
  func.func @_fused_kernel(%arg0: memref<16x4xf32, #tpu.memory_space<vmem>>, %arg1: memref<4x128xf32, #tpu.memory_space<vmem>>, %arg2: memref<32x128xf32, #tpu.memory_space<vmem>>, %arg3: memref<1x128xf32, #tpu.memory_space<vmem>>, %arg4: memref<4x128xf32, #tpu.memory_space<vmem>>, %arg5: memref<32x128xf32, #tpu.memory_space<vmem>>, %arg6: memref<1x128xf32, #tpu.memory_space<vmem>>, %arg7: memref<64x128xf32, #tpu.memory_space<vmem>>, %arg8: memref<32x128xf32, #tpu.memory_space<vmem>>, %arg9: memref<1x128xf32, #tpu.memory_space<vmem>>, %arg10: memref<64x128xf32, #tpu.memory_space<vmem>>, %arg11: memref<32x128xf32, #tpu.memory_space<vmem>>, %arg12: memref<1x128xf32, #tpu.memory_space<vmem>>, %arg13: memref<64x32xf32, #tpu.memory_space<vmem>>, %arg14: memref<1x32xf32, #tpu.memory_space<vmem>>, %arg15: memref<32x16xf32, #tpu.memory_space<vmem>>, %arg16: memref<1x16xf32, #tpu.memory_space<vmem>>, %arg17: memref<16x128xf32, #tpu.memory_space<vmem>>, %arg18: memref<1x128xf32, #tpu.memory_space<vmem>>, %arg19: memref<2x128xf32, #tpu.memory_space<vmem>>) attributes {dimension_semantics = [], scalar_prefetch = 0 : i64, scratch_operands = 0 : i64, tpu.core_type = #tpu.core_type<tc>} {
    %0 = tpu.iota {dimensions = array<i32: 1>} : vector<2x128xi32>
    %c64_i32 = arith.constant 64 : i32
    %1 = vector.broadcast %c64_i32 : i32 to vector<2x128xi32>
    %2 = arith.cmpi sge, %0, %1 : vector<2x128xi32>
    %c96_i32 = arith.constant 96 : i32
    %3 = vector.broadcast %c96_i32 : i32 to vector<2x128xi32>
    %4 = arith.cmpi slt, %0, %3 : vector<2x128xi32>
    %5 = arith.andi %2, %4 : vector<2x128xi1>
    %cst = arith.constant 0.000000e+00 : f32
    %6 = vector.broadcast %cst : f32 to vector<2x32xf32>
    %c0 = arith.constant 0 : index
    %c0_0 = arith.constant 0 : index
    %7 = vector.load %arg0[%c0, %c0_0] : memref<16x4xf32, #tpu.memory_space<vmem>>, vector<16x4xf32>
    %c0_1 = arith.constant 0 : index
    %c0_2 = arith.constant 0 : index
    %8 = vector.load %arg1[%c0_1, %c0_2] : memref<4x128xf32, #tpu.memory_space<vmem>>, vector<4x128xf32>
    %cst_3 = arith.constant dense<0.000000e+00> : vector<16x128xf32>
    %9 = tpu.matmul %7, %8, %cst_3 {dimension_numbers = #tpu.dot_dimension_numbers<[1], [0], [0], [1], [0, 0, 1, 1], [], []>} : vector<16x4xf32>, vector<4x128xf32>, vector<16x128xf32> -> vector<16x128xf32>
    %c0_4 = arith.constant 0 : index
    %c0_5 = arith.constant 0 : index
    %10 = vector.load %arg3[%c0_4, %c0_5] : memref<1x128xf32, #tpu.memory_space<vmem>>, vector<1x128xf32>
    %11 = vector.broadcast %10 : vector<1x128xf32> to vector<16x128xf32>
    %12 = arith.addf %9, %11 : vector<16x128xf32>
    %c0_6 = arith.constant 0 : index
    %c0_7 = arith.constant 0 : index
    %13 = vector.load %arg4[%c0_6, %c0_7] : memref<4x128xf32, #tpu.memory_space<vmem>>, vector<4x128xf32>
    %cst_8 = arith.constant dense<0.000000e+00> : vector<16x128xf32>
    %14 = tpu.matmul %7, %13, %cst_8 {dimension_numbers = #tpu.dot_dimension_numbers<[1], [0], [0], [1], [0, 0, 1, 1], [], []>} : vector<16x4xf32>, vector<4x128xf32>, vector<16x128xf32> -> vector<16x128xf32>
    %c0_9 = arith.constant 0 : index
    %c0_10 = arith.constant 0 : index
    %15 = vector.load %arg6[%c0_9, %c0_10] : memref<1x128xf32, #tpu.memory_space<vmem>>, vector<1x128xf32>
    %16 = vector.broadcast %15 : vector<1x128xf32> to vector<16x128xf32>
    %17 = arith.addf %14, %16 : vector<16x128xf32>
    %c0_11 = arith.constant 0 : index
    %c0_12 = arith.constant 0 : index
    %18 = vector.load %arg2[%c0_11, %c0_12] : memref<32x128xf32, #tpu.memory_space<vmem>>, vector<32x128xf32>
    %c0_13 = arith.constant 0 : index
    %c0_14 = arith.constant 0 : index
    %19 = vector.load %arg5[%c0_13, %c0_14] : memref<32x128xf32, #tpu.memory_space<vmem>>, vector<32x128xf32>
    %20 = vector.extract_strided_slice %12 {offsets = [0, 0], sizes = [2, 128], strides = [1, 1]} : vector<16x128xf32> to vector<2x128xf32>
    %cst_15 = arith.constant dense<0.000000e+00> : vector<2x128xf32>
    %21 = tpu.matmul %6, %18, %cst_15 {dimension_numbers = #tpu.dot_dimension_numbers<[1], [0], [0], [1], [0, 0, 1, 1], [], []>} : vector<2x32xf32>, vector<32x128xf32>, vector<2x128xf32> -> vector<2x128xf32>
    %22 = arith.addf %20, %21 : vector<2x128xf32>
    %23 = math.tanh %22 : vector<2x128xf32>
    %24 = arith.negf %22 : vector<2x128xf32>
    %25 = math.exp %24 : vector<2x128xf32>
    %cst_16 = arith.constant 1.000000e+00 : f32
    %26 = vector.broadcast %cst_16 : f32 to vector<2x128xf32>
    %27 = arith.addf %26, %25 : vector<2x128xf32>
    %28 = arith.divf %26, %27 : vector<2x128xf32>
    %29 = arith.select %5, %23, %28 : vector<2x128xi1>, vector<2x128xf32>
    %30 = vector.extract_strided_slice %29 {offsets = [0, 0], sizes = [2, 32], strides = [1, 1]} : vector<2x128xf32> to vector<2x32xf32>
    %31 = vector.extract_strided_slice %29 {offsets = [0, 32], sizes = [2, 32], strides = [1, 1]} : vector<2x128xf32> to vector<2x32xf32>
    %32 = vector.extract_strided_slice %29 {offsets = [0, 64], sizes = [2, 32], strides = [1, 1]} : vector<2x128xf32> to vector<2x32xf32>
    %33 = vector.extract_strided_slice %29 {offsets = [0, 96], sizes = [2, 32], strides = [1, 1]} : vector<2x128xf32> to vector<2x32xf32>
    %34 = arith.mulf %31, %6 : vector<2x32xf32>
    %35 = arith.mulf %30, %32 : vector<2x32xf32>
    %36 = arith.addf %34, %35 : vector<2x32xf32>
    %37 = math.tanh %36 : vector<2x32xf32>
    %38 = arith.mulf %33, %37 : vector<2x32xf32>
    %39 = vector.extract_strided_slice %17 {offsets = [14, 0], sizes = [2, 128], strides = [1, 1]} : vector<16x128xf32> to vector<2x128xf32>
    %cst_17 = arith.constant dense<0.000000e+00> : vector<2x128xf32>
    %40 = tpu.matmul %6, %19, %cst_17 {dimension_numbers = #tpu.dot_dimension_numbers<[1], [0], [0], [1], [0, 0, 1, 1], [], []>} : vector<2x32xf32>, vector<32x128xf32>, vector<2x128xf32> -> vector<2x128xf32>
    %41 = arith.addf %39, %40 : vector<2x128xf32>
    %42 = math.tanh %41 : vector<2x128xf32>
    %43 = arith.negf %41 : vector<2x128xf32>
    %44 = math.exp %43 : vector<2x128xf32>
    %cst_18 = arith.constant 1.000000e+00 : f32
    %45 = vector.broadcast %cst_18 : f32 to vector<2x128xf32>
    %46 = arith.addf %45, %44 : vector<2x128xf32>
    %47 = arith.divf %45, %46 : vector<2x128xf32>
    %48 = arith.select %5, %42, %47 : vector<2x128xi1>, vector<2x128xf32>
    %49 = vector.extract_strided_slice %48 {offsets = [0, 0], sizes = [2, 32], strides = [1, 1]} : vector<2x128xf32> to vector<2x32xf32>
    %50 = vector.extract_strided_slice %48 {offsets = [0, 32], sizes = [2, 32], strides = [1, 1]} : vector<2x128xf32> to vector<2x32xf32>
    %51 = vector.extract_strided_slice %48 {offsets = [0, 64], sizes = [2, 32], strides = [1, 1]} : vector<2x128xf32> to vector<2x32xf32>
    %52 = vector.extract_strided_slice %48 {offsets = [0, 96], sizes = [2, 32], strides = [1, 1]} : vector<2x128xf32> to vector<2x32xf32>
    %53 = arith.mulf %50, %6 : vector<2x32xf32>
    %54 = arith.mulf %49, %51 : vector<2x32xf32>
    %55 = arith.addf %53, %54 : vector<2x32xf32>
    %56 = math.tanh %55 : vector<2x32xf32>
    %57 = arith.mulf %52, %56 : vector<2x32xf32>
    %58 = vector.extract_strided_slice %12 {offsets = [2, 0], sizes = [2, 128], strides = [1, 1]} : vector<16x128xf32> to vector<2x128xf32>
    %cst_19 = arith.constant dense<0.000000e+00> : vector<2x128xf32>
    %59 = tpu.matmul %38, %18, %cst_19 {dimension_numbers = #tpu.dot_dimension_numbers<[1], [0], [0], [1], [0, 0, 1, 1], [], []>} : vector<2x32xf32>, vector<32x128xf32>, vector<2x128xf32> -> vector<2x128xf32>
    %60 = arith.addf %58, %59 : vector<2x128xf32>
    %61 = math.tanh %60 : vector<2x128xf32>
    %62 = arith.negf %60 : vector<2x128xf32>
    %63 = math.exp %62 : vector<2x128xf32>
    %cst_20 = arith.constant 1.000000e+00 : f32
    %64 = vector.broadcast %cst_20 : f32 to vector<2x128xf32>
    %65 = arith.addf %64, %63 : vector<2x128xf32>
    %66 = arith.divf %64, %65 : vector<2x128xf32>
    %67 = arith.select %5, %61, %66 : vector<2x128xi1>, vector<2x128xf32>
    %68 = vector.extract_strided_slice %67 {offsets = [0, 0], sizes = [2, 32], strides = [1, 1]} : vector<2x128xf32> to vector<2x32xf32>
    %69 = vector.extract_strided_slice %67 {offsets = [0, 32], sizes = [2, 32], strides = [1, 1]} : vector<2x128xf32> to vector<2x32xf32>
    %70 = vector.extract_strided_slice %67 {offsets = [0, 64], sizes = [2, 32], strides = [1, 1]} : vector<2x128xf32> to vector<2x32xf32>
    %71 = vector.extract_strided_slice %67 {offsets = [0, 96], sizes = [2, 32], strides = [1, 1]} : vector<2x128xf32> to vector<2x32xf32>
    %72 = arith.mulf %69, %36 : vector<2x32xf32>
    %73 = arith.mulf %68, %70 : vector<2x32xf32>
    %74 = arith.addf %72, %73 : vector<2x32xf32>
    %75 = math.tanh %74 : vector<2x32xf32>
    %76 = arith.mulf %71, %75 : vector<2x32xf32>
    %77 = vector.extract_strided_slice %17 {offsets = [12, 0], sizes = [2, 128], strides = [1, 1]} : vector<16x128xf32> to vector<2x128xf32>
    %cst_21 = arith.constant dense<0.000000e+00> : vector<2x128xf32>
    %78 = tpu.matmul %57, %19, %cst_21 {dimension_numbers = #tpu.dot_dimension_numbers<[1], [0], [0], [1], [0, 0, 1, 1], [], []>} : vector<2x32xf32>, vector<32x128xf32>, vector<2x128xf32> -> vector<2x128xf32>
    %79 = arith.addf %77, %78 : vector<2x128xf32>
    %80 = math.tanh %79 : vector<2x128xf32>
    %81 = arith.negf %79 : vector<2x128xf32>
    %82 = math.exp %81 : vector<2x128xf32>
    %cst_22 = arith.constant 1.000000e+00 : f32
    %83 = vector.broadcast %cst_22 : f32 to vector<2x128xf32>
    %84 = arith.addf %83, %82 : vector<2x128xf32>
    %85 = arith.divf %83, %84 : vector<2x128xf32>
    %86 = arith.select %5, %80, %85 : vector<2x128xi1>, vector<2x128xf32>
    %87 = vector.extract_strided_slice %86 {offsets = [0, 0], sizes = [2, 32], strides = [1, 1]} : vector<2x128xf32> to vector<2x32xf32>
    %88 = vector.extract_strided_slice %86 {offsets = [0, 32], sizes = [2, 32], strides = [1, 1]} : vector<2x128xf32> to vector<2x32xf32>
    %89 = vector.extract_strided_slice %86 {offsets = [0, 64], sizes = [2, 32], strides = [1, 1]} : vector<2x128xf32> to vector<2x32xf32>
    %90 = vector.extract_strided_slice %86 {offsets = [0, 96], sizes = [2, 32], strides = [1, 1]} : vector<2x128xf32> to vector<2x32xf32>
    %91 = arith.mulf %88, %55 : vector<2x32xf32>
    %92 = arith.mulf %87, %89 : vector<2x32xf32>
    %93 = arith.addf %91, %92 : vector<2x32xf32>
    %94 = math.tanh %93 : vector<2x32xf32>
    %95 = arith.mulf %90, %94 : vector<2x32xf32>
    %96 = vector.extract_strided_slice %12 {offsets = [4, 0], sizes = [2, 128], strides = [1, 1]} : vector<16x128xf32> to vector<2x128xf32>
    %cst_23 = arith.constant dense<0.000000e+00> : vector<2x128xf32>
    %97 = tpu.matmul %76, %18, %cst_23 {dimension_numbers = #tpu.dot_dimension_numbers<[1], [0], [0], [1], [0, 0, 1, 1], [], []>} : vector<2x32xf32>, vector<32x128xf32>, vector<2x128xf32> -> vector<2x128xf32>
    %98 = arith.addf %96, %97 : vector<2x128xf32>
    %99 = math.tanh %98 : vector<2x128xf32>
    %100 = arith.negf %98 : vector<2x128xf32>
    %101 = math.exp %100 : vector<2x128xf32>
    %cst_24 = arith.constant 1.000000e+00 : f32
    %102 = vector.broadcast %cst_24 : f32 to vector<2x128xf32>
    %103 = arith.addf %102, %101 : vector<2x128xf32>
    %104 = arith.divf %102, %103 : vector<2x128xf32>
    %105 = arith.select %5, %99, %104 : vector<2x128xi1>, vector<2x128xf32>
    %106 = vector.extract_strided_slice %105 {offsets = [0, 0], sizes = [2, 32], strides = [1, 1]} : vector<2x128xf32> to vector<2x32xf32>
    %107 = vector.extract_strided_slice %105 {offsets = [0, 32], sizes = [2, 32], strides = [1, 1]} : vector<2x128xf32> to vector<2x32xf32>
    %108 = vector.extract_strided_slice %105 {offsets = [0, 64], sizes = [2, 32], strides = [1, 1]} : vector<2x128xf32> to vector<2x32xf32>
    %109 = vector.extract_strided_slice %105 {offsets = [0, 96], sizes = [2, 32], strides = [1, 1]} : vector<2x128xf32> to vector<2x32xf32>
    %110 = arith.mulf %107, %74 : vector<2x32xf32>
    %111 = arith.mulf %106, %108 : vector<2x32xf32>
    %112 = arith.addf %110, %111 : vector<2x32xf32>
    %113 = math.tanh %112 : vector<2x32xf32>
    %114 = arith.mulf %109, %113 : vector<2x32xf32>
    %115 = vector.extract_strided_slice %17 {offsets = [10, 0], sizes = [2, 128], strides = [1, 1]} : vector<16x128xf32> to vector<2x128xf32>
    %cst_25 = arith.constant dense<0.000000e+00> : vector<2x128xf32>
    %116 = tpu.matmul %95, %19, %cst_25 {dimension_numbers = #tpu.dot_dimension_numbers<[1], [0], [0], [1], [0, 0, 1, 1], [], []>} : vector<2x32xf32>, vector<32x128xf32>, vector<2x128xf32> -> vector<2x128xf32>
    %117 = arith.addf %115, %116 : vector<2x128xf32>
    %118 = math.tanh %117 : vector<2x128xf32>
    %119 = arith.negf %117 : vector<2x128xf32>
    %120 = math.exp %119 : vector<2x128xf32>
    %cst_26 = arith.constant 1.000000e+00 : f32
    %121 = vector.broadcast %cst_26 : f32 to vector<2x128xf32>
    %122 = arith.addf %121, %120 : vector<2x128xf32>
    %123 = arith.divf %121, %122 : vector<2x128xf32>
    %124 = arith.select %5, %118, %123 : vector<2x128xi1>, vector<2x128xf32>
    %125 = vector.extract_strided_slice %124 {offsets = [0, 0], sizes = [2, 32], strides = [1, 1]} : vector<2x128xf32> to vector<2x32xf32>
    %126 = vector.extract_strided_slice %124 {offsets = [0, 32], sizes = [2, 32], strides = [1, 1]} : vector<2x128xf32> to vector<2x32xf32>
    %127 = vector.extract_strided_slice %124 {offsets = [0, 64], sizes = [2, 32], strides = [1, 1]} : vector<2x128xf32> to vector<2x32xf32>
    %128 = vector.extract_strided_slice %124 {offsets = [0, 96], sizes = [2, 32], strides = [1, 1]} : vector<2x128xf32> to vector<2x32xf32>
    %129 = arith.mulf %126, %93 : vector<2x32xf32>
    %130 = arith.mulf %125, %127 : vector<2x32xf32>
    %131 = arith.addf %129, %130 : vector<2x32xf32>
    %132 = math.tanh %131 : vector<2x32xf32>
    %133 = arith.mulf %128, %132 : vector<2x32xf32>
    %134 = vector.extract_strided_slice %12 {offsets = [6, 0], sizes = [2, 128], strides = [1, 1]} : vector<16x128xf32> to vector<2x128xf32>
    %cst_27 = arith.constant dense<0.000000e+00> : vector<2x128xf32>
    %135 = tpu.matmul %114, %18, %cst_27 {dimension_numbers = #tpu.dot_dimension_numbers<[1], [0], [0], [1], [0, 0, 1, 1], [], []>} : vector<2x32xf32>, vector<32x128xf32>, vector<2x128xf32> -> vector<2x128xf32>
    %136 = arith.addf %134, %135 : vector<2x128xf32>
    %137 = math.tanh %136 : vector<2x128xf32>
    %138 = arith.negf %136 : vector<2x128xf32>
    %139 = math.exp %138 : vector<2x128xf32>
    %cst_28 = arith.constant 1.000000e+00 : f32
    %140 = vector.broadcast %cst_28 : f32 to vector<2x128xf32>
    %141 = arith.addf %140, %139 : vector<2x128xf32>
    %142 = arith.divf %140, %141 : vector<2x128xf32>
    %143 = arith.select %5, %137, %142 : vector<2x128xi1>, vector<2x128xf32>
    %144 = vector.extract_strided_slice %143 {offsets = [0, 0], sizes = [2, 32], strides = [1, 1]} : vector<2x128xf32> to vector<2x32xf32>
    %145 = vector.extract_strided_slice %143 {offsets = [0, 32], sizes = [2, 32], strides = [1, 1]} : vector<2x128xf32> to vector<2x32xf32>
    %146 = vector.extract_strided_slice %143 {offsets = [0, 64], sizes = [2, 32], strides = [1, 1]} : vector<2x128xf32> to vector<2x32xf32>
    %147 = vector.extract_strided_slice %143 {offsets = [0, 96], sizes = [2, 32], strides = [1, 1]} : vector<2x128xf32> to vector<2x32xf32>
    %148 = arith.mulf %145, %112 : vector<2x32xf32>
    %149 = arith.mulf %144, %146 : vector<2x32xf32>
    %150 = arith.addf %148, %149 : vector<2x32xf32>
    %151 = math.tanh %150 : vector<2x32xf32>
    %152 = arith.mulf %147, %151 : vector<2x32xf32>
    %153 = vector.extract_strided_slice %17 {offsets = [8, 0], sizes = [2, 128], strides = [1, 1]} : vector<16x128xf32> to vector<2x128xf32>
    %cst_29 = arith.constant dense<0.000000e+00> : vector<2x128xf32>
    %154 = tpu.matmul %133, %19, %cst_29 {dimension_numbers = #tpu.dot_dimension_numbers<[1], [0], [0], [1], [0, 0, 1, 1], [], []>} : vector<2x32xf32>, vector<32x128xf32>, vector<2x128xf32> -> vector<2x128xf32>
    %155 = arith.addf %153, %154 : vector<2x128xf32>
    %156 = math.tanh %155 : vector<2x128xf32>
    %157 = arith.negf %155 : vector<2x128xf32>
    %158 = math.exp %157 : vector<2x128xf32>
    %cst_30 = arith.constant 1.000000e+00 : f32
    %159 = vector.broadcast %cst_30 : f32 to vector<2x128xf32>
    %160 = arith.addf %159, %158 : vector<2x128xf32>
    %161 = arith.divf %159, %160 : vector<2x128xf32>
    %162 = arith.select %5, %156, %161 : vector<2x128xi1>, vector<2x128xf32>
    %163 = vector.extract_strided_slice %162 {offsets = [0, 0], sizes = [2, 32], strides = [1, 1]} : vector<2x128xf32> to vector<2x32xf32>
    %164 = vector.extract_strided_slice %162 {offsets = [0, 32], sizes = [2, 32], strides = [1, 1]} : vector<2x128xf32> to vector<2x32xf32>
    %165 = vector.extract_strided_slice %162 {offsets = [0, 64], sizes = [2, 32], strides = [1, 1]} : vector<2x128xf32> to vector<2x32xf32>
    %166 = vector.extract_strided_slice %162 {offsets = [0, 96], sizes = [2, 32], strides = [1, 1]} : vector<2x128xf32> to vector<2x32xf32>
    %167 = arith.mulf %164, %131 : vector<2x32xf32>
    %168 = arith.mulf %163, %165 : vector<2x32xf32>
    %169 = arith.addf %167, %168 : vector<2x32xf32>
    %170 = math.tanh %169 : vector<2x32xf32>
    %171 = arith.mulf %166, %170 : vector<2x32xf32>
    %172 = vector.extract_strided_slice %12 {offsets = [8, 0], sizes = [2, 128], strides = [1, 1]} : vector<16x128xf32> to vector<2x128xf32>
    %cst_31 = arith.constant dense<0.000000e+00> : vector<2x128xf32>
    %173 = tpu.matmul %152, %18, %cst_31 {dimension_numbers = #tpu.dot_dimension_numbers<[1], [0], [0], [1], [0, 0, 1, 1], [], []>} : vector<2x32xf32>, vector<32x128xf32>, vector<2x128xf32> -> vector<2x128xf32>
    %174 = arith.addf %172, %173 : vector<2x128xf32>
    %175 = math.tanh %174 : vector<2x128xf32>
    %176 = arith.negf %174 : vector<2x128xf32>
    %177 = math.exp %176 : vector<2x128xf32>
    %cst_32 = arith.constant 1.000000e+00 : f32
    %178 = vector.broadcast %cst_32 : f32 to vector<2x128xf32>
    %179 = arith.addf %178, %177 : vector<2x128xf32>
    %180 = arith.divf %178, %179 : vector<2x128xf32>
    %181 = arith.select %5, %175, %180 : vector<2x128xi1>, vector<2x128xf32>
    %182 = vector.extract_strided_slice %181 {offsets = [0, 0], sizes = [2, 32], strides = [1, 1]} : vector<2x128xf32> to vector<2x32xf32>
    %183 = vector.extract_strided_slice %181 {offsets = [0, 32], sizes = [2, 32], strides = [1, 1]} : vector<2x128xf32> to vector<2x32xf32>
    %184 = vector.extract_strided_slice %181 {offsets = [0, 64], sizes = [2, 32], strides = [1, 1]} : vector<2x128xf32> to vector<2x32xf32>
    %185 = vector.extract_strided_slice %181 {offsets = [0, 96], sizes = [2, 32], strides = [1, 1]} : vector<2x128xf32> to vector<2x32xf32>
    %186 = arith.mulf %183, %150 : vector<2x32xf32>
    %187 = arith.mulf %182, %184 : vector<2x32xf32>
    %188 = arith.addf %186, %187 : vector<2x32xf32>
    %189 = math.tanh %188 : vector<2x32xf32>
    %190 = arith.mulf %185, %189 : vector<2x32xf32>
    %191 = vector.extract_strided_slice %17 {offsets = [6, 0], sizes = [2, 128], strides = [1, 1]} : vector<16x128xf32> to vector<2x128xf32>
    %cst_33 = arith.constant dense<0.000000e+00> : vector<2x128xf32>
    %192 = tpu.matmul %171, %19, %cst_33 {dimension_numbers = #tpu.dot_dimension_numbers<[1], [0], [0], [1], [0, 0, 1, 1], [], []>} : vector<2x32xf32>, vector<32x128xf32>, vector<2x128xf32> -> vector<2x128xf32>
    %193 = arith.addf %191, %192 : vector<2x128xf32>
    %194 = math.tanh %193 : vector<2x128xf32>
    %195 = arith.negf %193 : vector<2x128xf32>
    %196 = math.exp %195 : vector<2x128xf32>
    %cst_34 = arith.constant 1.000000e+00 : f32
    %197 = vector.broadcast %cst_34 : f32 to vector<2x128xf32>
    %198 = arith.addf %197, %196 : vector<2x128xf32>
    %199 = arith.divf %197, %198 : vector<2x128xf32>
    %200 = arith.select %5, %194, %199 : vector<2x128xi1>, vector<2x128xf32>
    %201 = vector.extract_strided_slice %200 {offsets = [0, 0], sizes = [2, 32], strides = [1, 1]} : vector<2x128xf32> to vector<2x32xf32>
    %202 = vector.extract_strided_slice %200 {offsets = [0, 32], sizes = [2, 32], strides = [1, 1]} : vector<2x128xf32> to vector<2x32xf32>
    %203 = vector.extract_strided_slice %200 {offsets = [0, 64], sizes = [2, 32], strides = [1, 1]} : vector<2x128xf32> to vector<2x32xf32>
    %204 = vector.extract_strided_slice %200 {offsets = [0, 96], sizes = [2, 32], strides = [1, 1]} : vector<2x128xf32> to vector<2x32xf32>
    %205 = arith.mulf %202, %169 : vector<2x32xf32>
    %206 = arith.mulf %201, %203 : vector<2x32xf32>
    %207 = arith.addf %205, %206 : vector<2x32xf32>
    %208 = math.tanh %207 : vector<2x32xf32>
    %209 = arith.mulf %204, %208 : vector<2x32xf32>
    %210 = vector.extract_strided_slice %12 {offsets = [10, 0], sizes = [2, 128], strides = [1, 1]} : vector<16x128xf32> to vector<2x128xf32>
    %cst_35 = arith.constant dense<0.000000e+00> : vector<2x128xf32>
    %211 = tpu.matmul %190, %18, %cst_35 {dimension_numbers = #tpu.dot_dimension_numbers<[1], [0], [0], [1], [0, 0, 1, 1], [], []>} : vector<2x32xf32>, vector<32x128xf32>, vector<2x128xf32> -> vector<2x128xf32>
    %212 = arith.addf %210, %211 : vector<2x128xf32>
    %213 = math.tanh %212 : vector<2x128xf32>
    %214 = arith.negf %212 : vector<2x128xf32>
    %215 = math.exp %214 : vector<2x128xf32>
    %cst_36 = arith.constant 1.000000e+00 : f32
    %216 = vector.broadcast %cst_36 : f32 to vector<2x128xf32>
    %217 = arith.addf %216, %215 : vector<2x128xf32>
    %218 = arith.divf %216, %217 : vector<2x128xf32>
    %219 = arith.select %5, %213, %218 : vector<2x128xi1>, vector<2x128xf32>
    %220 = vector.extract_strided_slice %219 {offsets = [0, 0], sizes = [2, 32], strides = [1, 1]} : vector<2x128xf32> to vector<2x32xf32>
    %221 = vector.extract_strided_slice %219 {offsets = [0, 32], sizes = [2, 32], strides = [1, 1]} : vector<2x128xf32> to vector<2x32xf32>
    %222 = vector.extract_strided_slice %219 {offsets = [0, 64], sizes = [2, 32], strides = [1, 1]} : vector<2x128xf32> to vector<2x32xf32>
    %223 = vector.extract_strided_slice %219 {offsets = [0, 96], sizes = [2, 32], strides = [1, 1]} : vector<2x128xf32> to vector<2x32xf32>
    %224 = arith.mulf %221, %188 : vector<2x32xf32>
    %225 = arith.mulf %220, %222 : vector<2x32xf32>
    %226 = arith.addf %224, %225 : vector<2x32xf32>
    %227 = math.tanh %226 : vector<2x32xf32>
    %228 = arith.mulf %223, %227 : vector<2x32xf32>
    %229 = vector.extract_strided_slice %17 {offsets = [4, 0], sizes = [2, 128], strides = [1, 1]} : vector<16x128xf32> to vector<2x128xf32>
    %cst_37 = arith.constant dense<0.000000e+00> : vector<2x128xf32>
    %230 = tpu.matmul %209, %19, %cst_37 {dimension_numbers = #tpu.dot_dimension_numbers<[1], [0], [0], [1], [0, 0, 1, 1], [], []>} : vector<2x32xf32>, vector<32x128xf32>, vector<2x128xf32> -> vector<2x128xf32>
    %231 = arith.addf %229, %230 : vector<2x128xf32>
    %232 = math.tanh %231 : vector<2x128xf32>
    %233 = arith.negf %231 : vector<2x128xf32>
    %234 = math.exp %233 : vector<2x128xf32>
    %cst_38 = arith.constant 1.000000e+00 : f32
    %235 = vector.broadcast %cst_38 : f32 to vector<2x128xf32>
    %236 = arith.addf %235, %234 : vector<2x128xf32>
    %237 = arith.divf %235, %236 : vector<2x128xf32>
    %238 = arith.select %5, %232, %237 : vector<2x128xi1>, vector<2x128xf32>
    %239 = vector.extract_strided_slice %238 {offsets = [0, 0], sizes = [2, 32], strides = [1, 1]} : vector<2x128xf32> to vector<2x32xf32>
    %240 = vector.extract_strided_slice %238 {offsets = [0, 32], sizes = [2, 32], strides = [1, 1]} : vector<2x128xf32> to vector<2x32xf32>
    %241 = vector.extract_strided_slice %238 {offsets = [0, 64], sizes = [2, 32], strides = [1, 1]} : vector<2x128xf32> to vector<2x32xf32>
    %242 = vector.extract_strided_slice %238 {offsets = [0, 96], sizes = [2, 32], strides = [1, 1]} : vector<2x128xf32> to vector<2x32xf32>
    %243 = arith.mulf %240, %207 : vector<2x32xf32>
    %244 = arith.mulf %239, %241 : vector<2x32xf32>
    %245 = arith.addf %243, %244 : vector<2x32xf32>
    %246 = math.tanh %245 : vector<2x32xf32>
    %247 = arith.mulf %242, %246 : vector<2x32xf32>
    %248 = vector.extract_strided_slice %12 {offsets = [12, 0], sizes = [2, 128], strides = [1, 1]} : vector<16x128xf32> to vector<2x128xf32>
    %cst_39 = arith.constant dense<0.000000e+00> : vector<2x128xf32>
    %249 = tpu.matmul %228, %18, %cst_39 {dimension_numbers = #tpu.dot_dimension_numbers<[1], [0], [0], [1], [0, 0, 1, 1], [], []>} : vector<2x32xf32>, vector<32x128xf32>, vector<2x128xf32> -> vector<2x128xf32>
    %250 = arith.addf %248, %249 : vector<2x128xf32>
    %251 = math.tanh %250 : vector<2x128xf32>
    %252 = arith.negf %250 : vector<2x128xf32>
    %253 = math.exp %252 : vector<2x128xf32>
    %cst_40 = arith.constant 1.000000e+00 : f32
    %254 = vector.broadcast %cst_40 : f32 to vector<2x128xf32>
    %255 = arith.addf %254, %253 : vector<2x128xf32>
    %256 = arith.divf %254, %255 : vector<2x128xf32>
    %257 = arith.select %5, %251, %256 : vector<2x128xi1>, vector<2x128xf32>
    %258 = vector.extract_strided_slice %257 {offsets = [0, 0], sizes = [2, 32], strides = [1, 1]} : vector<2x128xf32> to vector<2x32xf32>
    %259 = vector.extract_strided_slice %257 {offsets = [0, 32], sizes = [2, 32], strides = [1, 1]} : vector<2x128xf32> to vector<2x32xf32>
    %260 = vector.extract_strided_slice %257 {offsets = [0, 64], sizes = [2, 32], strides = [1, 1]} : vector<2x128xf32> to vector<2x32xf32>
    %261 = vector.extract_strided_slice %257 {offsets = [0, 96], sizes = [2, 32], strides = [1, 1]} : vector<2x128xf32> to vector<2x32xf32>
    %262 = arith.mulf %259, %226 : vector<2x32xf32>
    %263 = arith.mulf %258, %260 : vector<2x32xf32>
    %264 = arith.addf %262, %263 : vector<2x32xf32>
    %265 = math.tanh %264 : vector<2x32xf32>
    %266 = arith.mulf %261, %265 : vector<2x32xf32>
    %267 = vector.extract_strided_slice %17 {offsets = [2, 0], sizes = [2, 128], strides = [1, 1]} : vector<16x128xf32> to vector<2x128xf32>
    %cst_41 = arith.constant dense<0.000000e+00> : vector<2x128xf32>
    %268 = tpu.matmul %247, %19, %cst_41 {dimension_numbers = #tpu.dot_dimension_numbers<[1], [0], [0], [1], [0, 0, 1, 1], [], []>} : vector<2x32xf32>, vector<32x128xf32>, vector<2x128xf32> -> vector<2x128xf32>
    %269 = arith.addf %267, %268 : vector<2x128xf32>
    %270 = math.tanh %269 : vector<2x128xf32>
    %271 = arith.negf %269 : vector<2x128xf32>
    %272 = math.exp %271 : vector<2x128xf32>
    %cst_42 = arith.constant 1.000000e+00 : f32
    %273 = vector.broadcast %cst_42 : f32 to vector<2x128xf32>
    %274 = arith.addf %273, %272 : vector<2x128xf32>
    %275 = arith.divf %273, %274 : vector<2x128xf32>
    %276 = arith.select %5, %270, %275 : vector<2x128xi1>, vector<2x128xf32>
    %277 = vector.extract_strided_slice %276 {offsets = [0, 0], sizes = [2, 32], strides = [1, 1]} : vector<2x128xf32> to vector<2x32xf32>
    %278 = vector.extract_strided_slice %276 {offsets = [0, 32], sizes = [2, 32], strides = [1, 1]} : vector<2x128xf32> to vector<2x32xf32>
    %279 = vector.extract_strided_slice %276 {offsets = [0, 64], sizes = [2, 32], strides = [1, 1]} : vector<2x128xf32> to vector<2x32xf32>
    %280 = vector.extract_strided_slice %276 {offsets = [0, 96], sizes = [2, 32], strides = [1, 1]} : vector<2x128xf32> to vector<2x32xf32>
    %281 = arith.mulf %278, %245 : vector<2x32xf32>
    %282 = arith.mulf %277, %279 : vector<2x32xf32>
    %283 = arith.addf %281, %282 : vector<2x32xf32>
    %284 = math.tanh %283 : vector<2x32xf32>
    %285 = arith.mulf %280, %284 : vector<2x32xf32>
    %286 = vector.extract_strided_slice %12 {offsets = [14, 0], sizes = [2, 128], strides = [1, 1]} : vector<16x128xf32> to vector<2x128xf32>
    %cst_43 = arith.constant dense<0.000000e+00> : vector<2x128xf32>
    %287 = tpu.matmul %266, %18, %cst_43 {dimension_numbers = #tpu.dot_dimension_numbers<[1], [0], [0], [1], [0, 0, 1, 1], [], []>} : vector<2x32xf32>, vector<32x128xf32>, vector<2x128xf32> -> vector<2x128xf32>
    %288 = arith.addf %286, %287 : vector<2x128xf32>
    %289 = math.tanh %288 : vector<2x128xf32>
    %290 = arith.negf %288 : vector<2x128xf32>
    %291 = math.exp %290 : vector<2x128xf32>
    %cst_44 = arith.constant 1.000000e+00 : f32
    %292 = vector.broadcast %cst_44 : f32 to vector<2x128xf32>
    %293 = arith.addf %292, %291 : vector<2x128xf32>
    %294 = arith.divf %292, %293 : vector<2x128xf32>
    %295 = arith.select %5, %289, %294 : vector<2x128xi1>, vector<2x128xf32>
    %296 = vector.extract_strided_slice %295 {offsets = [0, 0], sizes = [2, 32], strides = [1, 1]} : vector<2x128xf32> to vector<2x32xf32>
    %297 = vector.extract_strided_slice %295 {offsets = [0, 32], sizes = [2, 32], strides = [1, 1]} : vector<2x128xf32> to vector<2x32xf32>
    %298 = vector.extract_strided_slice %295 {offsets = [0, 64], sizes = [2, 32], strides = [1, 1]} : vector<2x128xf32> to vector<2x32xf32>
    %299 = vector.extract_strided_slice %295 {offsets = [0, 96], sizes = [2, 32], strides = [1, 1]} : vector<2x128xf32> to vector<2x32xf32>
    %300 = arith.mulf %297, %264 : vector<2x32xf32>
    %301 = arith.mulf %296, %298 : vector<2x32xf32>
    %302 = arith.addf %300, %301 : vector<2x32xf32>
    %303 = math.tanh %302 : vector<2x32xf32>
    %304 = arith.mulf %299, %303 : vector<2x32xf32>
    %305 = vector.extract_strided_slice %17 {offsets = [0, 0], sizes = [2, 128], strides = [1, 1]} : vector<16x128xf32> to vector<2x128xf32>
    %cst_45 = arith.constant dense<0.000000e+00> : vector<2x128xf32>
    %306 = tpu.matmul %285, %19, %cst_45 {dimension_numbers = #tpu.dot_dimension_numbers<[1], [0], [0], [1], [0, 0, 1, 1], [], []>} : vector<2x32xf32>, vector<32x128xf32>, vector<2x128xf32> -> vector<2x128xf32>
    %307 = arith.addf %305, %306 : vector<2x128xf32>
    %308 = math.tanh %307 : vector<2x128xf32>
    %309 = arith.negf %307 : vector<2x128xf32>
    %310 = math.exp %309 : vector<2x128xf32>
    %cst_46 = arith.constant 1.000000e+00 : f32
    %311 = vector.broadcast %cst_46 : f32 to vector<2x128xf32>
    %312 = arith.addf %311, %310 : vector<2x128xf32>
    %313 = arith.divf %311, %312 : vector<2x128xf32>
    %314 = arith.select %5, %308, %313 : vector<2x128xi1>, vector<2x128xf32>
    %315 = vector.extract_strided_slice %314 {offsets = [0, 0], sizes = [2, 32], strides = [1, 1]} : vector<2x128xf32> to vector<2x32xf32>
    %316 = vector.extract_strided_slice %314 {offsets = [0, 32], sizes = [2, 32], strides = [1, 1]} : vector<2x128xf32> to vector<2x32xf32>
    %317 = vector.extract_strided_slice %314 {offsets = [0, 64], sizes = [2, 32], strides = [1, 1]} : vector<2x128xf32> to vector<2x32xf32>
    %318 = vector.extract_strided_slice %314 {offsets = [0, 96], sizes = [2, 32], strides = [1, 1]} : vector<2x128xf32> to vector<2x32xf32>
    %319 = arith.mulf %316, %283 : vector<2x32xf32>
    %320 = arith.mulf %315, %317 : vector<2x32xf32>
    %321 = arith.addf %319, %320 : vector<2x32xf32>
    %322 = math.tanh %321 : vector<2x32xf32>
    %323 = arith.mulf %318, %322 : vector<2x32xf32>
    %324 = tpu.concatenate %38, %76, %114, %152, %190, %228, %266, %304 in 0 : vector<2x32xf32>, vector<2x32xf32>, vector<2x32xf32>, vector<2x32xf32>, vector<2x32xf32>, vector<2x32xf32>, vector<2x32xf32>, vector<2x32xf32> -> vector<16x32xf32>
    %325 = tpu.concatenate %323, %285, %247, %209, %171, %133, %95, %57 in 0 : vector<2x32xf32>, vector<2x32xf32>, vector<2x32xf32>, vector<2x32xf32>, vector<2x32xf32>, vector<2x32xf32>, vector<2x32xf32>, vector<2x32xf32> -> vector<16x32xf32>
    %c0_47 = arith.constant 0 : index
    %c0_48 = arith.constant 0 : index
    %326 = vector.load %arg7[%c0_47, %c0_48] : memref<64x128xf32, #tpu.memory_space<vmem>>, vector<64x128xf32>
    %327 = vector.extract_strided_slice %326 {offsets = [0, 0], sizes = [32, 128], strides = [1, 1]} : vector<64x128xf32> to vector<32x128xf32>
    %cst_49 = arith.constant dense<0.000000e+00> : vector<16x128xf32>
    %328 = tpu.matmul %324, %327, %cst_49 {dimension_numbers = #tpu.dot_dimension_numbers<[1], [0], [0], [1], [0, 0, 1, 1], [], []>} : vector<16x32xf32>, vector<32x128xf32>, vector<16x128xf32> -> vector<16x128xf32>
    %329 = vector.extract_strided_slice %326 {offsets = [32, 0], sizes = [32, 128], strides = [1, 1]} : vector<64x128xf32> to vector<32x128xf32>
    %cst_50 = arith.constant dense<0.000000e+00> : vector<16x128xf32>
    %330 = tpu.matmul %325, %329, %cst_50 {dimension_numbers = #tpu.dot_dimension_numbers<[1], [0], [0], [1], [0, 0, 1, 1], [], []>} : vector<16x32xf32>, vector<32x128xf32>, vector<16x128xf32> -> vector<16x128xf32>
    %331 = arith.addf %328, %330 : vector<16x128xf32>
    %c0_51 = arith.constant 0 : index
    %c0_52 = arith.constant 0 : index
    %332 = vector.load %arg9[%c0_51, %c0_52] : memref<1x128xf32, #tpu.memory_space<vmem>>, vector<1x128xf32>
    %333 = vector.broadcast %332 : vector<1x128xf32> to vector<16x128xf32>
    %334 = arith.addf %331, %333 : vector<16x128xf32>
    %c0_53 = arith.constant 0 : index
    %c0_54 = arith.constant 0 : index
    %335 = vector.load %arg8[%c0_53, %c0_54] : memref<32x128xf32, #tpu.memory_space<vmem>>, vector<32x128xf32>
    %336 = vector.extract_strided_slice %334 {offsets = [0, 0], sizes = [2, 128], strides = [1, 1]} : vector<16x128xf32> to vector<2x128xf32>
    %cst_55 = arith.constant dense<0.000000e+00> : vector<2x128xf32>
    %337 = tpu.matmul %6, %335, %cst_55 {dimension_numbers = #tpu.dot_dimension_numbers<[1], [0], [0], [1], [0, 0, 1, 1], [], []>} : vector<2x32xf32>, vector<32x128xf32>, vector<2x128xf32> -> vector<2x128xf32>
    %338 = arith.addf %336, %337 : vector<2x128xf32>
    %339 = math.tanh %338 : vector<2x128xf32>
    %340 = arith.negf %338 : vector<2x128xf32>
    %341 = math.exp %340 : vector<2x128xf32>
    %cst_56 = arith.constant 1.000000e+00 : f32
    %342 = vector.broadcast %cst_56 : f32 to vector<2x128xf32>
    %343 = arith.addf %342, %341 : vector<2x128xf32>
    %344 = arith.divf %342, %343 : vector<2x128xf32>
    %345 = arith.select %5, %339, %344 : vector<2x128xi1>, vector<2x128xf32>
    %346 = vector.extract_strided_slice %345 {offsets = [0, 0], sizes = [2, 32], strides = [1, 1]} : vector<2x128xf32> to vector<2x32xf32>
    %347 = vector.extract_strided_slice %345 {offsets = [0, 32], sizes = [2, 32], strides = [1, 1]} : vector<2x128xf32> to vector<2x32xf32>
    %348 = vector.extract_strided_slice %345 {offsets = [0, 64], sizes = [2, 32], strides = [1, 1]} : vector<2x128xf32> to vector<2x32xf32>
    %349 = vector.extract_strided_slice %345 {offsets = [0, 96], sizes = [2, 32], strides = [1, 1]} : vector<2x128xf32> to vector<2x32xf32>
    %350 = arith.mulf %347, %6 : vector<2x32xf32>
    %351 = arith.mulf %346, %348 : vector<2x32xf32>
    %352 = arith.addf %350, %351 : vector<2x32xf32>
    %353 = math.tanh %352 : vector<2x32xf32>
    %354 = arith.mulf %349, %353 : vector<2x32xf32>
    %355 = vector.extract_strided_slice %334 {offsets = [2, 0], sizes = [2, 128], strides = [1, 1]} : vector<16x128xf32> to vector<2x128xf32>
    %cst_57 = arith.constant dense<0.000000e+00> : vector<2x128xf32>
    %356 = tpu.matmul %354, %335, %cst_57 {dimension_numbers = #tpu.dot_dimension_numbers<[1], [0], [0], [1], [0, 0, 1, 1], [], []>} : vector<2x32xf32>, vector<32x128xf32>, vector<2x128xf32> -> vector<2x128xf32>
    %357 = arith.addf %355, %356 : vector<2x128xf32>
    %358 = math.tanh %357 : vector<2x128xf32>
    %359 = arith.negf %357 : vector<2x128xf32>
    %360 = math.exp %359 : vector<2x128xf32>
    %cst_58 = arith.constant 1.000000e+00 : f32
    %361 = vector.broadcast %cst_58 : f32 to vector<2x128xf32>
    %362 = arith.addf %361, %360 : vector<2x128xf32>
    %363 = arith.divf %361, %362 : vector<2x128xf32>
    %364 = arith.select %5, %358, %363 : vector<2x128xi1>, vector<2x128xf32>
    %365 = vector.extract_strided_slice %364 {offsets = [0, 0], sizes = [2, 32], strides = [1, 1]} : vector<2x128xf32> to vector<2x32xf32>
    %366 = vector.extract_strided_slice %364 {offsets = [0, 32], sizes = [2, 32], strides = [1, 1]} : vector<2x128xf32> to vector<2x32xf32>
    %367 = vector.extract_strided_slice %364 {offsets = [0, 64], sizes = [2, 32], strides = [1, 1]} : vector<2x128xf32> to vector<2x32xf32>
    %368 = vector.extract_strided_slice %364 {offsets = [0, 96], sizes = [2, 32], strides = [1, 1]} : vector<2x128xf32> to vector<2x32xf32>
    %369 = arith.mulf %366, %352 : vector<2x32xf32>
    %370 = arith.mulf %365, %367 : vector<2x32xf32>
    %371 = arith.addf %369, %370 : vector<2x32xf32>
    %372 = math.tanh %371 : vector<2x32xf32>
    %373 = arith.mulf %368, %372 : vector<2x32xf32>
    %374 = vector.extract_strided_slice %334 {offsets = [4, 0], sizes = [2, 128], strides = [1, 1]} : vector<16x128xf32> to vector<2x128xf32>
    %cst_59 = arith.constant dense<0.000000e+00> : vector<2x128xf32>
    %375 = tpu.matmul %373, %335, %cst_59 {dimension_numbers = #tpu.dot_dimension_numbers<[1], [0], [0], [1], [0, 0, 1, 1], [], []>} : vector<2x32xf32>, vector<32x128xf32>, vector<2x128xf32> -> vector<2x128xf32>
    %376 = arith.addf %374, %375 : vector<2x128xf32>
    %377 = math.tanh %376 : vector<2x128xf32>
    %378 = arith.negf %376 : vector<2x128xf32>
    %379 = math.exp %378 : vector<2x128xf32>
    %cst_60 = arith.constant 1.000000e+00 : f32
    %380 = vector.broadcast %cst_60 : f32 to vector<2x128xf32>
    %381 = arith.addf %380, %379 : vector<2x128xf32>
    %382 = arith.divf %380, %381 : vector<2x128xf32>
    %383 = arith.select %5, %377, %382 : vector<2x128xi1>, vector<2x128xf32>
    %384 = vector.extract_strided_slice %383 {offsets = [0, 0], sizes = [2, 32], strides = [1, 1]} : vector<2x128xf32> to vector<2x32xf32>
    %385 = vector.extract_strided_slice %383 {offsets = [0, 32], sizes = [2, 32], strides = [1, 1]} : vector<2x128xf32> to vector<2x32xf32>
    %386 = vector.extract_strided_slice %383 {offsets = [0, 64], sizes = [2, 32], strides = [1, 1]} : vector<2x128xf32> to vector<2x32xf32>
    %387 = vector.extract_strided_slice %383 {offsets = [0, 96], sizes = [2, 32], strides = [1, 1]} : vector<2x128xf32> to vector<2x32xf32>
    %388 = arith.mulf %385, %371 : vector<2x32xf32>
    %389 = arith.mulf %384, %386 : vector<2x32xf32>
    %390 = arith.addf %388, %389 : vector<2x32xf32>
    %391 = math.tanh %390 : vector<2x32xf32>
    %392 = arith.mulf %387, %391 : vector<2x32xf32>
    %393 = vector.extract_strided_slice %334 {offsets = [6, 0], sizes = [2, 128], strides = [1, 1]} : vector<16x128xf32> to vector<2x128xf32>
    %cst_61 = arith.constant dense<0.000000e+00> : vector<2x128xf32>
    %394 = tpu.matmul %392, %335, %cst_61 {dimension_numbers = #tpu.dot_dimension_numbers<[1], [0], [0], [1], [0, 0, 1, 1], [], []>} : vector<2x32xf32>, vector<32x128xf32>, vector<2x128xf32> -> vector<2x128xf32>
    %395 = arith.addf %393, %394 : vector<2x128xf32>
    %396 = math.tanh %395 : vector<2x128xf32>
    %397 = arith.negf %395 : vector<2x128xf32>
    %398 = math.exp %397 : vector<2x128xf32>
    %cst_62 = arith.constant 1.000000e+00 : f32
    %399 = vector.broadcast %cst_62 : f32 to vector<2x128xf32>
    %400 = arith.addf %399, %398 : vector<2x128xf32>
    %401 = arith.divf %399, %400 : vector<2x128xf32>
    %402 = arith.select %5, %396, %401 : vector<2x128xi1>, vector<2x128xf32>
    %403 = vector.extract_strided_slice %402 {offsets = [0, 0], sizes = [2, 32], strides = [1, 1]} : vector<2x128xf32> to vector<2x32xf32>
    %404 = vector.extract_strided_slice %402 {offsets = [0, 32], sizes = [2, 32], strides = [1, 1]} : vector<2x128xf32> to vector<2x32xf32>
    %405 = vector.extract_strided_slice %402 {offsets = [0, 64], sizes = [2, 32], strides = [1, 1]} : vector<2x128xf32> to vector<2x32xf32>
    %406 = vector.extract_strided_slice %402 {offsets = [0, 96], sizes = [2, 32], strides = [1, 1]} : vector<2x128xf32> to vector<2x32xf32>
    %407 = arith.mulf %404, %390 : vector<2x32xf32>
    %408 = arith.mulf %403, %405 : vector<2x32xf32>
    %409 = arith.addf %407, %408 : vector<2x32xf32>
    %410 = math.tanh %409 : vector<2x32xf32>
    %411 = arith.mulf %406, %410 : vector<2x32xf32>
    %412 = vector.extract_strided_slice %334 {offsets = [8, 0], sizes = [2, 128], strides = [1, 1]} : vector<16x128xf32> to vector<2x128xf32>
    %cst_63 = arith.constant dense<0.000000e+00> : vector<2x128xf32>
    %413 = tpu.matmul %411, %335, %cst_63 {dimension_numbers = #tpu.dot_dimension_numbers<[1], [0], [0], [1], [0, 0, 1, 1], [], []>} : vector<2x32xf32>, vector<32x128xf32>, vector<2x128xf32> -> vector<2x128xf32>
    %414 = arith.addf %412, %413 : vector<2x128xf32>
    %415 = math.tanh %414 : vector<2x128xf32>
    %416 = arith.negf %414 : vector<2x128xf32>
    %417 = math.exp %416 : vector<2x128xf32>
    %cst_64 = arith.constant 1.000000e+00 : f32
    %418 = vector.broadcast %cst_64 : f32 to vector<2x128xf32>
    %419 = arith.addf %418, %417 : vector<2x128xf32>
    %420 = arith.divf %418, %419 : vector<2x128xf32>
    %421 = arith.select %5, %415, %420 : vector<2x128xi1>, vector<2x128xf32>
    %422 = vector.extract_strided_slice %421 {offsets = [0, 0], sizes = [2, 32], strides = [1, 1]} : vector<2x128xf32> to vector<2x32xf32>
    %423 = vector.extract_strided_slice %421 {offsets = [0, 32], sizes = [2, 32], strides = [1, 1]} : vector<2x128xf32> to vector<2x32xf32>
    %424 = vector.extract_strided_slice %421 {offsets = [0, 64], sizes = [2, 32], strides = [1, 1]} : vector<2x128xf32> to vector<2x32xf32>
    %425 = vector.extract_strided_slice %421 {offsets = [0, 96], sizes = [2, 32], strides = [1, 1]} : vector<2x128xf32> to vector<2x32xf32>
    %426 = arith.mulf %423, %409 : vector<2x32xf32>
    %427 = arith.mulf %422, %424 : vector<2x32xf32>
    %428 = arith.addf %426, %427 : vector<2x32xf32>
    %429 = math.tanh %428 : vector<2x32xf32>
    %430 = arith.mulf %425, %429 : vector<2x32xf32>
    %431 = vector.extract_strided_slice %334 {offsets = [10, 0], sizes = [2, 128], strides = [1, 1]} : vector<16x128xf32> to vector<2x128xf32>
    %cst_65 = arith.constant dense<0.000000e+00> : vector<2x128xf32>
    %432 = tpu.matmul %430, %335, %cst_65 {dimension_numbers = #tpu.dot_dimension_numbers<[1], [0], [0], [1], [0, 0, 1, 1], [], []>} : vector<2x32xf32>, vector<32x128xf32>, vector<2x128xf32> -> vector<2x128xf32>
    %433 = arith.addf %431, %432 : vector<2x128xf32>
    %434 = math.tanh %433 : vector<2x128xf32>
    %435 = arith.negf %433 : vector<2x128xf32>
    %436 = math.exp %435 : vector<2x128xf32>
    %cst_66 = arith.constant 1.000000e+00 : f32
    %437 = vector.broadcast %cst_66 : f32 to vector<2x128xf32>
    %438 = arith.addf %437, %436 : vector<2x128xf32>
    %439 = arith.divf %437, %438 : vector<2x128xf32>
    %440 = arith.select %5, %434, %439 : vector<2x128xi1>, vector<2x128xf32>
    %441 = vector.extract_strided_slice %440 {offsets = [0, 0], sizes = [2, 32], strides = [1, 1]} : vector<2x128xf32> to vector<2x32xf32>
    %442 = vector.extract_strided_slice %440 {offsets = [0, 32], sizes = [2, 32], strides = [1, 1]} : vector<2x128xf32> to vector<2x32xf32>
    %443 = vector.extract_strided_slice %440 {offsets = [0, 64], sizes = [2, 32], strides = [1, 1]} : vector<2x128xf32> to vector<2x32xf32>
    %444 = vector.extract_strided_slice %440 {offsets = [0, 96], sizes = [2, 32], strides = [1, 1]} : vector<2x128xf32> to vector<2x32xf32>
    %445 = arith.mulf %442, %428 : vector<2x32xf32>
    %446 = arith.mulf %441, %443 : vector<2x32xf32>
    %447 = arith.addf %445, %446 : vector<2x32xf32>
    %448 = math.tanh %447 : vector<2x32xf32>
    %449 = arith.mulf %444, %448 : vector<2x32xf32>
    %450 = vector.extract_strided_slice %334 {offsets = [12, 0], sizes = [2, 128], strides = [1, 1]} : vector<16x128xf32> to vector<2x128xf32>
    %cst_67 = arith.constant dense<0.000000e+00> : vector<2x128xf32>
    %451 = tpu.matmul %449, %335, %cst_67 {dimension_numbers = #tpu.dot_dimension_numbers<[1], [0], [0], [1], [0, 0, 1, 1], [], []>} : vector<2x32xf32>, vector<32x128xf32>, vector<2x128xf32> -> vector<2x128xf32>
    %452 = arith.addf %450, %451 : vector<2x128xf32>
    %453 = math.tanh %452 : vector<2x128xf32>
    %454 = arith.negf %452 : vector<2x128xf32>
    %455 = math.exp %454 : vector<2x128xf32>
    %cst_68 = arith.constant 1.000000e+00 : f32
    %456 = vector.broadcast %cst_68 : f32 to vector<2x128xf32>
    %457 = arith.addf %456, %455 : vector<2x128xf32>
    %458 = arith.divf %456, %457 : vector<2x128xf32>
    %459 = arith.select %5, %453, %458 : vector<2x128xi1>, vector<2x128xf32>
    %460 = vector.extract_strided_slice %459 {offsets = [0, 0], sizes = [2, 32], strides = [1, 1]} : vector<2x128xf32> to vector<2x32xf32>
    %461 = vector.extract_strided_slice %459 {offsets = [0, 32], sizes = [2, 32], strides = [1, 1]} : vector<2x128xf32> to vector<2x32xf32>
    %462 = vector.extract_strided_slice %459 {offsets = [0, 64], sizes = [2, 32], strides = [1, 1]} : vector<2x128xf32> to vector<2x32xf32>
    %463 = vector.extract_strided_slice %459 {offsets = [0, 96], sizes = [2, 32], strides = [1, 1]} : vector<2x128xf32> to vector<2x32xf32>
    %464 = arith.mulf %461, %447 : vector<2x32xf32>
    %465 = arith.mulf %460, %462 : vector<2x32xf32>
    %466 = arith.addf %464, %465 : vector<2x32xf32>
    %467 = math.tanh %466 : vector<2x32xf32>
    %468 = arith.mulf %463, %467 : vector<2x32xf32>
    %469 = vector.extract_strided_slice %334 {offsets = [14, 0], sizes = [2, 128], strides = [1, 1]} : vector<16x128xf32> to vector<2x128xf32>
    %cst_69 = arith.constant dense<0.000000e+00> : vector<2x128xf32>
    %470 = tpu.matmul %468, %335, %cst_69 {dimension_numbers = #tpu.dot_dimension_numbers<[1], [0], [0], [1], [0, 0, 1, 1], [], []>} : vector<2x32xf32>, vector<32x128xf32>, vector<2x128xf32> -> vector<2x128xf32>
    %471 = arith.addf %469, %470 : vector<2x128xf32>
    %472 = math.tanh %471 : vector<2x128xf32>
    %473 = arith.negf %471 : vector<2x128xf32>
    %474 = math.exp %473 : vector<2x128xf32>
    %cst_70 = arith.constant 1.000000e+00 : f32
    %475 = vector.broadcast %cst_70 : f32 to vector<2x128xf32>
    %476 = arith.addf %475, %474 : vector<2x128xf32>
    %477 = arith.divf %475, %476 : vector<2x128xf32>
    %478 = arith.select %5, %472, %477 : vector<2x128xi1>, vector<2x128xf32>
    %479 = vector.extract_strided_slice %478 {offsets = [0, 0], sizes = [2, 32], strides = [1, 1]} : vector<2x128xf32> to vector<2x32xf32>
    %480 = vector.extract_strided_slice %478 {offsets = [0, 32], sizes = [2, 32], strides = [1, 1]} : vector<2x128xf32> to vector<2x32xf32>
    %481 = vector.extract_strided_slice %478 {offsets = [0, 64], sizes = [2, 32], strides = [1, 1]} : vector<2x128xf32> to vector<2x32xf32>
    %482 = vector.extract_strided_slice %478 {offsets = [0, 96], sizes = [2, 32], strides = [1, 1]} : vector<2x128xf32> to vector<2x32xf32>
    %483 = arith.mulf %480, %466 : vector<2x32xf32>
    %484 = arith.mulf %479, %481 : vector<2x32xf32>
    %485 = arith.addf %483, %484 : vector<2x32xf32>
    %486 = math.tanh %485 : vector<2x32xf32>
    %487 = arith.mulf %482, %486 : vector<2x32xf32>
    %c0_71 = arith.constant 0 : index
    %c0_72 = arith.constant 0 : index
    %488 = vector.load %arg10[%c0_71, %c0_72] : memref<64x128xf32, #tpu.memory_space<vmem>>, vector<64x128xf32>
    %489 = vector.extract_strided_slice %488 {offsets = [0, 0], sizes = [32, 128], strides = [1, 1]} : vector<64x128xf32> to vector<32x128xf32>
    %cst_73 = arith.constant dense<0.000000e+00> : vector<2x128xf32>
    %490 = tpu.matmul %304, %489, %cst_73 {dimension_numbers = #tpu.dot_dimension_numbers<[1], [0], [0], [1], [0, 0, 1, 1], [], []>} : vector<2x32xf32>, vector<32x128xf32>, vector<2x128xf32> -> vector<2x128xf32>
    %491 = vector.extract_strided_slice %488 {offsets = [32, 0], sizes = [32, 128], strides = [1, 1]} : vector<64x128xf32> to vector<32x128xf32>
    %cst_74 = arith.constant dense<0.000000e+00> : vector<2x128xf32>
    %492 = tpu.matmul %57, %491, %cst_74 {dimension_numbers = #tpu.dot_dimension_numbers<[1], [0], [0], [1], [0, 0, 1, 1], [], []>} : vector<2x32xf32>, vector<32x128xf32>, vector<2x128xf32> -> vector<2x128xf32>
    %493 = arith.addf %490, %492 : vector<2x128xf32>
    %c0_75 = arith.constant 0 : index
    %c0_76 = arith.constant 0 : index
    %494 = vector.load %arg12[%c0_75, %c0_76] : memref<1x128xf32, #tpu.memory_space<vmem>>, vector<1x128xf32>
    %495 = vector.broadcast %494 : vector<1x128xf32> to vector<2x128xf32>
    %496 = arith.addf %493, %495 : vector<2x128xf32>
    %c0_77 = arith.constant 0 : index
    %c0_78 = arith.constant 0 : index
    %497 = vector.load %arg11[%c0_77, %c0_78] : memref<32x128xf32, #tpu.memory_space<vmem>>, vector<32x128xf32>
    %cst_79 = arith.constant dense<0.000000e+00> : vector<2x128xf32>
    %498 = tpu.matmul %6, %497, %cst_79 {dimension_numbers = #tpu.dot_dimension_numbers<[1], [0], [0], [1], [0, 0, 1, 1], [], []>} : vector<2x32xf32>, vector<32x128xf32>, vector<2x128xf32> -> vector<2x128xf32>
    %499 = arith.addf %496, %498 : vector<2x128xf32>
    %500 = math.tanh %499 : vector<2x128xf32>
    %501 = arith.negf %499 : vector<2x128xf32>
    %502 = math.exp %501 : vector<2x128xf32>
    %cst_80 = arith.constant 1.000000e+00 : f32
    %503 = vector.broadcast %cst_80 : f32 to vector<2x128xf32>
    %504 = arith.addf %503, %502 : vector<2x128xf32>
    %505 = arith.divf %503, %504 : vector<2x128xf32>
    %506 = arith.select %5, %500, %505 : vector<2x128xi1>, vector<2x128xf32>
    %507 = vector.extract_strided_slice %506 {offsets = [0, 0], sizes = [2, 32], strides = [1, 1]} : vector<2x128xf32> to vector<2x32xf32>
    %508 = vector.extract_strided_slice %506 {offsets = [0, 32], sizes = [2, 32], strides = [1, 1]} : vector<2x128xf32> to vector<2x32xf32>
    %509 = vector.extract_strided_slice %506 {offsets = [0, 64], sizes = [2, 32], strides = [1, 1]} : vector<2x128xf32> to vector<2x32xf32>
    %510 = vector.extract_strided_slice %506 {offsets = [0, 96], sizes = [2, 32], strides = [1, 1]} : vector<2x128xf32> to vector<2x32xf32>
    %511 = arith.mulf %508, %6 : vector<2x32xf32>
    %512 = arith.mulf %507, %509 : vector<2x32xf32>
    %513 = arith.addf %511, %512 : vector<2x32xf32>
    %514 = math.tanh %513 : vector<2x32xf32>
    %515 = arith.mulf %510, %514 : vector<2x32xf32>
    %c0_81 = arith.constant 0 : index
    %c0_82 = arith.constant 0 : index
    %516 = vector.load %arg13[%c0_81, %c0_82] : memref<64x32xf32, #tpu.memory_space<vmem>>, vector<64x32xf32>
    %517 = vector.extract_strided_slice %516 {offsets = [0, 0], sizes = [32, 32], strides = [1, 1]} : vector<64x32xf32> to vector<32x32xf32>
    %cst_83 = arith.constant dense<0.000000e+00> : vector<2x32xf32>
    %518 = tpu.matmul %487, %517, %cst_83 {dimension_numbers = #tpu.dot_dimension_numbers<[1], [0], [0], [1], [0, 0, 1, 1], [], []>} : vector<2x32xf32>, vector<32x32xf32>, vector<2x32xf32> -> vector<2x32xf32>
    %519 = vector.extract_strided_slice %516 {offsets = [32, 0], sizes = [32, 32], strides = [1, 1]} : vector<64x32xf32> to vector<32x32xf32>
    %cst_84 = arith.constant dense<0.000000e+00> : vector<2x32xf32>
    %520 = tpu.matmul %515, %519, %cst_84 {dimension_numbers = #tpu.dot_dimension_numbers<[1], [0], [0], [1], [0, 0, 1, 1], [], []>} : vector<2x32xf32>, vector<32x32xf32>, vector<2x32xf32> -> vector<2x32xf32>
    %521 = arith.addf %518, %520 : vector<2x32xf32>
    %c0_85 = arith.constant 0 : index
    %c0_86 = arith.constant 0 : index
    %522 = vector.load %arg14[%c0_85, %c0_86] : memref<1x32xf32, #tpu.memory_space<vmem>>, vector<1x32xf32>
    %523 = vector.broadcast %522 : vector<1x32xf32> to vector<2x32xf32>
    %524 = arith.addf %521, %523 : vector<2x32xf32>
    %cst_87 = arith.constant 0.000000e+00 : f32
    %525 = vector.broadcast %cst_87 : f32 to vector<2x32xf32>
    %526 = arith.maximumf %524, %525 : vector<2x32xf32>
    %c0_88 = arith.constant 0 : index
    %c0_89 = arith.constant 0 : index
    %527 = vector.load %arg15[%c0_88, %c0_89] : memref<32x16xf32, #tpu.memory_space<vmem>>, vector<32x16xf32>
    %cst_90 = arith.constant dense<0.000000e+00> : vector<2x16xf32>
    %528 = tpu.matmul %526, %527, %cst_90 {dimension_numbers = #tpu.dot_dimension_numbers<[1], [0], [0], [1], [0, 0, 1, 1], [], []>} : vector<2x32xf32>, vector<32x16xf32>, vector<2x16xf32> -> vector<2x16xf32>
    %c0_91 = arith.constant 0 : index
    %c0_92 = arith.constant 0 : index
    %529 = vector.load %arg16[%c0_91, %c0_92] : memref<1x16xf32, #tpu.memory_space<vmem>>, vector<1x16xf32>
    %530 = vector.broadcast %529 : vector<1x16xf32> to vector<2x16xf32>
    %531 = arith.addf %528, %530 : vector<2x16xf32>
    %cst_93 = arith.constant 0.000000e+00 : f32
    %532 = vector.broadcast %cst_93 : f32 to vector<2x16xf32>
    %533 = arith.maximumf %531, %532 : vector<2x16xf32>
    %c0_94 = arith.constant 0 : index
    %c0_95 = arith.constant 0 : index
    %534 = vector.load %arg17[%c0_94, %c0_95] : memref<16x128xf32, #tpu.memory_space<vmem>>, vector<16x128xf32>
    %cst_96 = arith.constant dense<0.000000e+00> : vector<2x128xf32>
    %535 = tpu.matmul %533, %534, %cst_96 {dimension_numbers = #tpu.dot_dimension_numbers<[1], [0], [0], [1], [0, 0, 1, 1], [], []>} : vector<2x16xf32>, vector<16x128xf32>, vector<2x128xf32> -> vector<2x128xf32>
    %c0_97 = arith.constant 0 : index
    %c0_98 = arith.constant 0 : index
    %536 = vector.load %arg18[%c0_97, %c0_98] : memref<1x128xf32, #tpu.memory_space<vmem>>, vector<1x128xf32>
    %537 = vector.broadcast %536 : vector<1x128xf32> to vector<2x128xf32>
    %538 = arith.addf %535, %537 : vector<2x128xf32>
    %c0_99 = arith.constant 0 : index
    %c0_100 = arith.constant 0 : index
    %539 = vector.load %arg19[%c0_99, %c0_100] : memref<2x128xf32, #tpu.memory_space<vmem>>, vector<2x128xf32>
    tpu.vector_store %arg19[%c0_99, %c0_100], %538 {strides = array<i32>} : memref<2x128xf32, #tpu.memory_space<vmem>>, vector<2x128xf32>,
    return
  }
}

</mosaic_0001>

<bundles_post_ra>
// kernel: air_quality_lstm_forward.1
= control target key start
LH: loop header
LB: loop body
LE: loop exit
PB: predicated region body
PF: predicated region fallthrough
CT: control target
= control target key end

     0   :  { %vm84_vm0 = vcmask 1043456   ;;  %vm77_vm1 = vcmask 31744   ;;  %v4631_v14 = vmov 0.0|0.0   ;;  %vm4632_vm2 = vmmov 0   ;;  %s5453_s1 = inlined_call_operand.vmem [shape: f32[4,128], index: 1, kind: input, shape index: {}]   ;;  %s5454_s4 = inlined_call_operand.vmem [shape: f32[4,128], index: 4, kind: input, shape index: {}]   ;;  %s5455_s0 = inlined_call_operand.vmem [shape: f32[16,4], index: 0, kind: input, shape index: {}]   ;;  %s5456_s2 = inlined_call_operand.vmem [shape: f32[32,128], index: 2, kind: input, shape index: {}]   ;;  %s5457_s5 = inlined_call_operand.vmem [shape: f32[32,128], index: 5, kind: input, shape index: {}]   ;;  %s5458_s6 = inlined_call_operand.vmem [shape: f32[1,128], index: 6, kind: input, shape index: {}]   ;;  %s5459_s3 = inlined_call_operand.vmem [shape: f32[1,128], index: 3, kind: input, shape index: {}]   ;;  %s5460_s7 = inlined_call_operand.vmem [shape: f32[64,128], index: 7, kind: input, shape index: {}]   ;;  %s5461_s8 = inlined_call_operand.vmem [shape: f32[32,128], index: 8, kind: input, shape index: {}]   ;;  %s5462_s9 = inlined_call_operand.vmem [shape: f32[1,128], index: 9, kind: input, shape index: {}]   ;;  %s5463_s10 = inlined_call_operand.vmem [shape: f32[64,128], index: 10, kind: input, shape index: {}]   ;;  %s5464_s11 = inlined_call_operand.vmem [shape: f32[32,128], index: 11, kind: input, shape index: {}]   ;;  %s5465_s12 = inlined_call_operand.vmem [shape: f32[1,128], index: 12, kind: input, shape index: {}]   ;;  %s5466_s13 = inlined_call_operand.vmem [shape: f32[64,32], index: 13, kind: input, shape index: {}]   ;;  %s5467_s15 = inlined_call_operand.vmem [shape: f32[32,16], index: 15, kind: input, shape index: {}]   ;;  %s5468_s14 = inlined_call_operand.vmem [shape: f32[1,32], index: 14, kind: input, shape index: {}]   ;;  %s5469_s17 = inlined_call_operand.vmem [shape: f32[16,128], index: 17, kind: input, shape index: {}]   ;;  %s5470_s16 = inlined_call_operand.vmem [shape: f32[1,16], index: 16, kind: input, shape index: {}]   ;;  %s5471_s18 = inlined_call_operand.vmem [shape: f32[1,128], index: 18, kind: input, shape index: {}]   ;;  %s5472_s19 = inlined_call_operand.vmem [shape: f32[2,128], index: 19, kind: output, shape index: {}]  }
   0x1   :  { %5475 = sst [smem:[#allocation2_spill]] %s5453_s1  ;;  %v253_v7 = vld [vmem:[%s5457_s5] sm:$0xff]  ;;  %v254_v8 = vld [vmem:[%s5457_s5 + $0x8] sm:$0xff]  ;;  %v255_v12 = vld [vmem:[%s5457_s5 + $0x10] sm:$0xff]  ;;  %v4633_v17 = vmov 0.0   ;;  %v62_v41 = vlaneseq  ;;  %vm257_vm6 = vcmask 261120  }
   0x2   :  { %5476 = sst [smem:[#allocation3_spill]] %s5454_s4  ;;  %s5479_s20 = sld [smem:[#allocation2_spill]]  ;;  %v4771_v10 = vpack.c.bf16 %v254_v8, %v253_v7  ;;  %v256_v13 = vld [vmem:[%s5457_s5 + $0x18] sm:$0xff]  ;;  %v3615_v18 = vld [vmem:[%s5458_s6] ss:$0 sm:$0xff]  ;;  %vm1956_vm7 = vcmask 1041408  }
   0x3   :  { %5477 = sst [smem:[#allocation4_spill]] %s5455_s0  ;;  %s5480_s22 = sld [smem:[#allocation3_spill]]  ;;  %v4790_v16 = vpack.c.bf16 %v256_v13, %v255_v12  ;;  %v3611_v22 = vld [vmem:[%s5459_s3] ss:$0 sm:$0xff]  ;;  %v63_v42 = vand.u32 127, %v62_v41  ;;  %vm1959_vm8 = vcmask 1045504  }
   0x4   :  { %5478 = sst [smem:[#allocation5_spill]] %s5456_s2  ;;  %s5481_s24 = sld [smem:[#allocation4_spill]]  ;;  %v3276_v45 = vld [vmem:[%s5466_s13 + $0x30] sm:$0xff]  ;;  %vm3532_vm9 = vcmask 130048  }
   0x5   :  { %s5482_s28 = sld [smem:[#allocation5_spill]]  ;;  %vm64_vm3 = vcmp.ge.s32.totalorder %v63_v42, 64  ;;  %vm65_vm4 = vcmp.lt.s32.totalorder %v63_v42, 96  ;;  %s4634_s3 = smov 64  }
   0x6   :  { %vm4832_vm5 = vmand %vm64_vm3, %vm65_vm4  ;;  %s4635_s6 = smov 32  }
   0x8   :  { %v69_v0 = vld [vmem:[%s5479_s20] sm:$0xf] }
   0x9   :  { %v163_v1 = vld [vmem:[%s5480_s22] sm:$0xf]  ;;  %3851 = vmatprep.subr.msk.mxu0 %vm84_vm0, %v69_v0 }
   0xa   :  { %v67_v2 = vld [vmem:[%s5481_s24] sm:$0xff]  ;;  %3856 = vmatprep.subr.msk.mxu1 %vm84_vm0, %v163_v1  ;;  %v68_v3 = vld [vmem:[%s5481_s24 + $0x8] sm:$0xff]  ;;  %3852 = vmatpush3.msk.msra.mxu0 %vm84_vm0, %v69_v0 }
   0xb   :  { %v249_v4 = vld [vmem:[%s5482_s28] sm:$0xff]  ;;  %v250_v5 = vld [vmem:[%s5482_s28 + $0x8] sm:$0xff]  ;;  %3857 = vmatpush3.msk.msra.mxu1 %vm84_vm0, %v163_v1  ;;  %v251_v9 = vld [vmem:[%s5482_s28 + $0x10] sm:$0xff]  ;;  %3858 = vmatprep.mubr.msk.f32.mxu1 %vm77_vm1, %v67_v2 }
   0xc   :  { %v4758_v6 = vpack.c.bf16 %v250_v5, %v249_v4  ;;  %3853 = vmatprep.mubr.msk.f32.mxu0 %vm77_vm1, %v67_v2  ;;  %v252_v11 = vld [vmem:[%s5482_s28 + $0x18] sm:$0xff]  ;;  %3859 = vmatmul.mubr.msk.f32.vlgmr.msra.gmra.mrb[0].mxu1 %vm77_vm1, %v68_v3 }
   0xd   :  { %4220 = vmatprep.subr.bf16.mxu0 %v4631_v14  ;;  %4226 = vmatprep.subr.bf16.mxu1 %v4631_v14  ;;  %v4788_v15 = vpack.c.bf16 %v252_v11, %v251_v9 }
   0xe   :  { %3854 = vmatmul.mubr.msk.f32.vlgmr.msra.gmra.mrb[0].mxu0 %vm77_vm1, %v68_v3  ;;  %4228 = vmatpush3.bf16.msra.mxu1 %v4771_v10 }
   0xf   :  { %4222 = vmatpush3.bf16.msra.mxu0 %v4758_v6  ;;  %4229 = vmatprep.subr.bf16.mxu1 %v4631_v14 }
  0x10   :  { %4223 = vmatprep.subr.bf16.mxu0 %v4631_v14  ;;  %3869 = vmatprep.mubr.msk.f32.mxu0 %vm4632_vm2, %v4633_v17 }
  0x11   :  { %3880 = vmatprep.mubr.msk.f32.mxu1 %vm4632_vm2, %v4633_v17 }
  0x12   :  { %4231 = vmatpush3.bf16.msra.mxu1 %v4790_v16 }
  0x13   :  { %4225 = vmatpush3.bf16.msra.mxu0 %v4788_v15  ;;  %4238 = vmatprep.subr.bf16.mxu1 %v4631_v14 }
  0x14   :  { %4232 = vmatprep.subr.bf16.mxu0 %v4631_v14 }
  0x15   :  { %3881 = vmatmul.mubr.f32.vlgmr.msra.gmra.mrb[2].mxu1 %v4633_v17 }
  0x16   :  { %3870 = vmatmul.mubr.f32.vlgmr.msra.gmra.mrb[2].mxu0 %v4633_v17  ;;  %4240 = vmatpush3.bf16.msra.mxu1 %v4771_v10 }
  0x17   :  { %4234 = vmatpush3.bf16.msra.mxu0 %v4758_v6  ;;  %4241 = vmatprep.subr.bf16.mxu1 %v4631_v14 }
  0x18   :  { %4235 = vmatprep.subr.bf16.mxu0 %v4631_v14  ;;  %3902 = vmatprep.mubr.msk.f32.mxu1 %vm4632_vm2, %v4633_v17 }
  0x19   :  { %3891 = vmatprep.mubr.msk.f32.mxu0 %vm4632_vm2, %v4633_v17 }
  0x1a   :  { %4243 = vmatpush3.bf16.msra.mxu1 %v4790_v16 }
  0x1b   :  { %4237 = vmatpush3.bf16.msra.mxu0 %v4788_v15  ;;  %4250 = vmatprep.subr.bf16.mxu1 %v4631_v14 }
  0x1c   :  { %4244 = vmatprep.subr.bf16.mxu0 %v4631_v14 }
  0xdf   :  { %v3860_v19 = vpop.f32.mrb[0].mxu1 }
  0xe0   :  { %v240_v20 = vpop.f32.mrb[1].mxu1  ;;  %v4828_v29 = vadd.f32 %v3860_v19, %v3615_v18 }
  0xe1   :  { %v3855_v21 = vpop.f32.mrb[0].mxu0  ;;  %v4822_v23 = vadd.f32 %v3615_v18, %v240_v20 }
  0xe2   :  { %v4824_v24 = vadd.f32 %v3855_v21, %v3611_v22  ;;  %v154_v25 = vpop.f32.mrb[1].mxu0 }
  0xe3   :  { %v4826_v26 = vadd.f32 %v3611_v22, %v154_v25 }
  0xe8   :  { %v423_v28 = vpop.f32.mrb[2].mxu1 }
  0xe9   :  { %v327_v27 = vpop.f32.mrb[2].mxu0  ;;  %v428_v31 = vrot.slane %v423_v28, 2  ;;  %v3882_v32 = vpop.f32.mrb[3].mxu1 }
  0xea   :  { %v331_v30 = vadd.f32 %v327_v27, %v4826_v26  ;;  %v3871_v33 = vpop.f32.mrb[3].mxu0 }
  0xeb   :  { %v430_v35 = vadd.f32 %v428_v31, %v4828_v29 }
  0xec   :  { %v3619_v34 = vmul.f32 -1.442695, %v331_v30 }
  0xed   :  { %v3620_v36 = vmul.f32 -1.442695, %v430_v35 }
  0xee   :  { %4431 = vpow2.f32 %v3619_v34 }
  0xef   :  { %4433 = vpow2.f32 %v3620_v36 }
  0xf0   :  { %4435 = vtanh.f32 %v430_v35 }
  0xf8   :  { %v4432_v37 = vpop.eup %4431 }
  0xf9   :  { %v4434_v38 = vpop.eup %4433  ;;  %v336_v39 = vadd.f32 1.0, %v4432_v37 }
  0xfa   :  { %v435_v40 = vadd.f32 1.0, %v4434_v38  ;;  %v4436_v43 = vpop.eup %4435 }
  0xfc   :  { %4437 = vrcp.f32 %v435_v40 }
  0xfd   :  { %4439 = vrcp.f32 %v336_v39 }
  0xfe   :  { %4441 = vtanh.f32 %v331_v30 }
 0x106   :  { %v4438_v44 = vpop.eup %4437 }
 0x107   :  { %v438_v46 = vsel %vm4832_vm5, %v4436_v43, %v4438_v44  ;;  %v4440_v47 = vpop.eup %4439 }
 0x108   :  { %441 = vrot.lane.b32.xlu0 %v438_v46, %s4634_s3  ;;  %v4442_v48 = vpop.eup %4441  ;;  %v439_v54 = vmul.f32 0.0, %v438_v46 }
 0x109   :  { %v339_v49 = vsel %vm4832_vm5, %v4442_v48, %v4440_v47 }
 0x10a   :  { %v340_v57 = vmul.f32 0.0, %v339_v49 }
 0x10c   :  { %342 = vrot.lane.b32.xlu0 %v339_v49, %s4634_s3 }
 0x17a   :  { %v442_v50 = vpop.permute.xlu0 %441 }
 0x17b   :  { %v444_v51 = vmul.f32 %v442_v50, %v438_v46 }
 0x17d   :  { %446 = vrot.lane.b32.xlu1 %v444_v51, %s4635_s6 }
 0x17e   :  { %v343_v52 = vpop.permute.xlu0 %342 }
 0x17f   :  { %v345_v53 = vmul.f32 %v343_v52, %v339_v49 }
 0x181   :  { %347 = vrot.lane.b32.xlu1 %v345_v53, %s4635_s6 }
 0x1ef   :  { %v447_v55 = vpop.permute.xlu1 %446 }
 0x1f0   :  { %v4844_v56 = vadd.f32 %v447_v55, %v439_v54 }
 0x1f2   :  { %4443 = vtanh.f32 %v4844_v56  ;;  %v652_v39 = vrot.slane %v4844_v56, 2 }
 0x1f3   :  { %v348_v58 = vpop.permute.xlu1 %347 }
 0x1f4   :  { %v4847_v59 = vadd.f32 %v348_v58, %v340_v57 }
 0x1f6   :  { %4445 = vtanh.f32 %v4847_v59  ;;  %v544_v40 = vrot.slane %v4847_v59, 6 }
 0x1fc   :  { %v4444_v60 = vpop.eup %4443 }
 0x1fd   :  { %452 = vrot.lane.b32.xlu0 %v4444_v60, %s4634_s3 }
 0x200   :  { %v4446_v61 = vpop.eup %4445 }
 0x201   :  { %353 = vrot.lane.b32.xlu1 %v4446_v61, %s4634_s3 }
 0x26f   :  { %v453_v62 = vpop.permute.xlu0 %452 }
 0x270   :  { %v4852_v63 = vmul.f32 %v453_v62, %v438_v46 }
 0x272   :  { %v564_v0 = vrot.slane %v4852_v63, 6 }
 0x273   :  { %v354_v1 = vpop.permute.xlu1 %353 }
 0x274   :  { %v4855_v2 = vmul.f32 %v354_v1, %v339_v49  ;;  %565 = vrot.lane.b32.xlu0 %v564_v0, %s4635_s6 }
 0x276   :  { %457 = vrot.lane.b32.xlu1 %v4855_v2, %s4635_s6 }
 0x2e6   :  { %v4860_v3 = vpop.permute.xlu0 %565 }
 0x2e7   :  { %3903 = vmatmul.mubr.msk.f32.vlgmr.msra.gmra.mrb[4].mxu1 %vm257_vm6, %v4860_v3 }
 0x2e8   :  { %v458_v4 = vpop.permute.xlu1 %457  ;;  %4252 = vmatpush3.bf16.msra.mxu1 %v4771_v10  ;;  %3924 = vmatprep.mubr.msk.f32.mxu1 %vm4632_vm2, %v4633_v17 }
 0x2e9   :  { %3892 = vmatmul.mubr.msk.f32.vlgmr.msra.gmra.mrb[4].mxu0 %vm257_vm6, %v458_v4  ;;  %4253 = vmatprep.subr.bf16.mxu1 %v4631_v14 }
 0x2ea   :  { %4246 = vmatpush3.bf16.msra.mxu0 %v4758_v6  ;;  %3913 = vmatprep.mubr.msk.f32.mxu0 %vm4632_vm2, %v4633_v17 }
 0x2eb   :  { %4247 = vmatprep.subr.bf16.mxu0 %v4631_v14 }
 0x2ec   :  { %4255 = vmatpush3.bf16.msra.mxu1 %v4790_v16 }
 0x2ed   :  { %4262 = vmatprep.subr.bf16.mxu1 %v4631_v14 }
 0x2ee   :  { %4249 = vmatpush3.bf16.msra.mxu0 %v4788_v15 }
 0x2ef   :  { %4256 = vmatprep.subr.bf16.mxu0 %v4631_v14 }
 0x3ba   :  { %v635_v5 = vpop.f32.mrb[4].mxu1 }
 0x3bb   :  { %v640_v7 = vrot.slane %v635_v5, 4  ;;  %v3904_v8 = vpop.f32.mrb[5].mxu1 }
 0x3bc   :  { %v527_v9 = vpop.f32.mrb[4].mxu0 }
 0x3bd   :  { %v642_v11 = vadd.f32 %v640_v7, %v4828_v29  ;;  %v532_v12 = vrot.slane %v527_v9, 6  ;;  %v3893_v13 = vpop.f32.mrb[5].mxu0 }
 0x3bf   :  { %v3624_v18 = vmul.f32 -1.442695, %v642_v11  ;;  %v534_v19 = vadd.f32 %v532_v12, %v4826_v26 }
 0x3c1   :  { %4447 = vpow2.f32 %v3624_v18  ;;  %v3622_v20 = vmul.f32 -1.442695, %v534_v19 }
 0x3c3   :  { %4449 = vpow2.f32 %v3622_v20 }
 0x3c4   :  { %4451 = vtanh.f32 %v642_v11 }
 0x3cb   :  { %v4448_v21 = vpop.eup %4447 }
 0x3cc   :  { %v647_v22 = vadd.f32 1.0, %v4448_v21 }
 0x3cd   :  { %v4450_v25 = vpop.eup %4449 }
 0x3ce   :  { %4453 = vrcp.f32 %v647_v22  ;;  %v539_v27 = vadd.f32 1.0, %v4450_v25  ;;  %v4452_v28 = vpop.eup %4451 }
 0x3cf   :  { %4455 = vtanh.f32 %v534_v19 }
 0x3d0   :  { %4457 = vrcp.f32 %v539_v27 }
 0x3d8   :  { %v4454_v30 = vpop.eup %4453 }
 0x3d9   :  { %v4456_v31 = vpop.eup %4455  ;;  %v650_v32 = vsel %vm4832_vm5, %v4452_v28, %v4454_v30 }
 0x3da   :  { %v4458_v33 = vpop.eup %4457  ;;  %656 = vrot.lane.b32.xlu0 %v650_v32, %s4634_s3  ;;  %v654_v41 = vmul.f32 %v652_v39, %v650_v32 }
 0x3db   :  { %v542_v34 = vsel %vm4832_vm5, %v4456_v31, %v4458_v33 }
 0x3dc   :  { %548 = vrot.lane.b32.xlu1 %v542_v34, %s4634_s3  ;;  %v546_v44 = vmul.f32 %v544_v40, %v542_v34 }
 0x44c   :  { %v657_v35 = vpop.permute.xlu0 %656 }
 0x44d   :  { %v659_v36 = vmul.f32 %v657_v35, %v650_v32 }
 0x44e   :  { %v549_v37 = vpop.permute.xlu1 %548 }
 0x44f   :  { %v551_v38 = vmul.f32 %v549_v37, %v542_v34  ;;  %661 = vrot.lane.b32.xlu0 %v659_v36, %s4635_s6 }
 0x451   :  { %553 = vrot.lane.b32.xlu1 %v551_v38, %s4635_s6 }
 0x4c1   :  { %v662_v42 = vpop.permute.xlu0 %661 }
 0x4c2   :  { %v4889_v43 = vadd.f32 %v662_v42, %v654_v41 }
 0x4c3   :  { %v554_v46 = vpop.permute.xlu1 %553 }
 0x4c4   :  { %4459 = vtanh.f32 %v4889_v43  ;;  %v4892_v47 = vadd.f32 %v554_v46, %v546_v44  ;;  %v868_v31 = vrot.slane %v4889_v43, 2 }
 0x4c6   :  { %4461 = vtanh.f32 %v4892_v47 }
 0x4ce   :  { %v4460_v48 = vpop.eup %4459 }
 0x4cf   :  { %667 = vrot.lane.b32.xlu0 %v4460_v48, %s4634_s3 }
 0x4d0   :  { %v4462_v49 = vpop.eup %4461 }
 0x4d1   :  { %559 = vrot.lane.b32.xlu1 %v4462_v49, %s4634_s3 }
 0x541   :  { %v668_v50 = vpop.permute.xlu0 %667 }
 0x542   :  { %v4897_v51 = vmul.f32 %v668_v50, %v650_v32  ;;  %v760_v32 = vrot.slane %v4892_v47, 6 }
 0x543   :  { %v560_v52 = vpop.permute.xlu1 %559 }
 0x544   :  { %v780_v53 = vrot.slane %v4897_v51, 4  ;;  %v4900_v54 = vmul.f32 %v560_v52, %v542_v34 }
 0x546   :  { %v672_v55 = vrot.slane %v4900_v54, 2  ;;  %781 = vrot.lane.b32.xlu0 %v780_v53, %s4635_s6  ;;  %v1957_v47 = vsel %vm1956_vm7, %v4855_v2, %v4900_v54 }
 0x548   :  { %673 = vrot.lane.b32.xlu1 %v672_v55, %s4635_s6 }
 0x5b8   :  { %v782_v56 = vpop.permute.xlu0 %781 }
 0x5b9   :  { %3925 = vmatmul.mubr.msk.f32.vlgmr.msra.gmra.mrb[6].mxu1 %vm257_vm6, %v782_v56 }
 0x5ba   :  { %v674_v57 = vpop.permute.xlu1 %673  ;;  %4264 = vmatpush3.bf16.msra.mxu1 %v4771_v10  ;;  %3946 = vmatprep.mubr.msk.f32.mxu1 %vm4632_vm2, %v4633_v17 }
 0x5bb   :  { %3914 = vmatmul.mubr.msk.f32.vlgmr.msra.gmra.mrb[6].mxu0 %vm257_vm6, %v674_v57  ;;  %4265 = vmatprep.subr.bf16.mxu1 %v4631_v14 }
 0x5bc   :  { %4258 = vmatpush3.bf16.msra.mxu0 %v4758_v6  ;;  %3935 = vmatprep.mubr.msk.f32.mxu0 %vm4632_vm2, %v4633_v17 }
 0x5bd   :  { %4259 = vmatprep.subr.bf16.mxu0 %v4631_v14 }
 0x5be   :  { %4267 = vmatpush3.bf16.msra.mxu1 %v4790_v16 }
 0x5bf   :  { %4274 = vmatprep.subr.bf16.mxu1 %v4631_v14 }
 0x5c0   :  { %4261 = vmatpush3.bf16.msra.mxu0 %v4788_v15 }
 0x5c1   :  { %4268 = vmatprep.subr.bf16.mxu0 %v4631_v14 }
 0x68c   :  { %v851_v58 = vpop.f32.mrb[6].mxu1 }
 0x68d   :  { %v856_v59 = vrot.slane %v851_v58, 6  ;;  %v3926_v60 = vpop.f32.mrb[7].mxu1 }
 0x68e   :  { %v743_v61 = vpop.f32.mrb[6].mxu0 }
 0x68f   :  { %v858_v62 = vadd.f32 %v856_v59, %v4828_v29  ;;  %v748_v0 = vrot.slane %v743_v61, 4  ;;  %v3915_v1 = vpop.f32.mrb[7].mxu0 }
 0x691   :  { %v3628_v4 = vmul.f32 -1.442695, %v858_v62  ;;  %v750_v5 = vadd.f32 %v748_v0, %v4826_v26 }
 0x693   :  { %4463 = vpow2.f32 %v3628_v4  ;;  %v3626_v7 = vmul.f32 -1.442695, %v750_v5 }
 0x695   :  { %4465 = vpow2.f32 %v3626_v7 }
 0x696   :  { %4467 = vtanh.f32 %v858_v62 }
 0x69d   :  { %v4464_v8 = vpop.eup %4463 }
 0x69e   :  { %v863_v9 = vadd.f32 1.0, %v4464_v8 }
 0x69f   :  { %v4466_v11 = vpop.eup %4465 }
 0x6a0   :  { %4469 = vrcp.f32 %v863_v9  ;;  %v755_v12 = vadd.f32 1.0, %v4466_v11  ;;  %v4468_v13 = vpop.eup %4467 }
 0x6a1   :  { %4471 = vtanh.f32 %v750_v5 }
 0x6a2   :  { %4473 = vrcp.f32 %v755_v12 }
 0x6aa   :  { %v4470_v18 = vpop.eup %4469 }
 0x6ab   :  { %v4472_v19 = vpop.eup %4471  ;;  %v866_v20 = vsel %vm4832_vm5, %v4468_v13, %v4470_v18 }
 0x6ac   :  { %v4474_v21 = vpop.eup %4473  ;;  %872 = vrot.lane.b32.xlu0 %v866_v20, %s4634_s3  ;;  %v870_v33 = vmul.f32 %v868_v31, %v866_v20 }
 0x6ad   :  { %v758_v22 = vsel %vm4832_vm5, %v4472_v19, %v4474_v21 }
 0x6ae   :  { %764 = vrot.lane.b32.xlu1 %v758_v22, %s4634_s3  ;;  %v762_v36 = vmul.f32 %v760_v32, %v758_v22 }
 0x71e   :  { %v873_v25 = vpop.permute.xlu0 %872 }
 0x71f   :  { %v875_v27 = vmul.f32 %v873_v25, %v866_v20 }
 0x720   :  { %v765_v28 = vpop.permute.xlu1 %764 }
 0x721   :  { %v767_v30 = vmul.f32 %v765_v28, %v758_v22  ;;  %877 = vrot.lane.b32.xlu0 %v875_v27, %s4635_s6 }
 0x723   :  { %769 = vrot.lane.b32.xlu1 %v767_v30, %s4635_s6 }
 0x793   :  { %v878_v34 = vpop.permute.xlu0 %877 }
 0x794   :  { %v4931_v35 = vadd.f32 %v878_v34, %v870_v33 }
 0x795   :  { %v770_v37 = vpop.permute.xlu1 %769 }
 0x796   :  { %4475 = vtanh.f32 %v4931_v35  ;;  %v4934_v38 = vadd.f32 %v770_v37, %v762_v36  ;;  %v1081_v18 = vrot.slane %v4931_v35, 2 }
 0x798   :  { %4477 = vtanh.f32 %v4934_v38  ;;  %v976_v21 = vrot.slane %v4934_v38, 6 }
 0x7a0   :  { %v4476_v39 = vpop.eup %4475 }
 0x7a1   :  { %883 = vrot.lane.b32.xlu0 %v4476_v39, %s4634_s3 }
 0x7a2   :  { %v4478_v40 = vpop.eup %4477 }
 0x7a3   :  { %775 = vrot.lane.b32.xlu1 %v4478_v40, %s4634_s3 }
 0x813   :  { %v884_v41 = vpop.permute.xlu0 %883 }
 0x814   :  { %v4939_v42 = vmul.f32 %v884_v41, %v866_v20 }
 0x815   :  { %v776_v43 = vpop.permute.xlu1 %775 }
 0x816   :  { %v996_v44 = vrot.slane %v4939_v42, 2  ;;  %v778_v46 = vmul.f32 %v776_v43, %v758_v22 }
 0x818   :  { %v888_v48 = vrot.slane %v778_v46, 4  ;;  %997 = vrot.lane.b32.xlu0 %v996_v44, %s4635_s6  ;;  %v4947_v49 = vsel %vm84_vm0, %v1957_v47, %v778_v46 }
 0x81a   :  { %889 = vrot.lane.b32.xlu1 %v888_v48, %s4635_s6 }
 0x88a   :  { %v998_v50 = vpop.permute.xlu0 %997 }
 0x88b   :  { %3947 = vmatmul.mubr.msk.f32.vlgmr.msra.gmra.mrb[8].mxu1 %vm257_vm6, %v998_v50 }
 0x88c   :  { %v890_v52 = vpop.permute.xlu1 %889  ;;  %4276 = vmatpush3.bf16.msra.mxu1 %v4771_v10  ;;  %3968 = vmatprep.mubr.msk.f32.mxu1 %vm4632_vm2, %v4633_v17 }
 0x88d   :  { %3936 = vmatmul.mubr.msk.f32.vlgmr.msra.gmra.mrb[8].mxu0 %vm257_vm6, %v890_v52  ;;  %4277 = vmatprep.subr.bf16.mxu1 %v4631_v14 }
 0x88e   :  { %4270 = vmatpush3.bf16.msra.mxu0 %v4758_v6  ;;  %3957 = vmatprep.mubr.msk.f32.mxu0 %vm4632_vm2, %v4633_v17 }
 0x88f   :  { %4271 = vmatprep.subr.bf16.mxu0 %v4631_v14 }
 0x890   :  { %4279 = vmatpush3.bf16.msra.mxu1 %v4790_v16 }
 0x891   :  { %4286 = vmatprep.subr.bf16.mxu1 %v4631_v14 }
 0x892   :  { %4273 = vmatpush3.bf16.msra.mxu0 %v4788_v15 }
 0x893   :  { %4280 = vmatprep.subr.bf16.mxu0 %v4631_v14 }
 0x95e   :  { %v1067_v2 = vpop.f32.mrb[8].mxu1 }
 0x95f   :  { %v1071_v53 = vadd.f32 %v1067_v2, %v4828_v29  ;;  %v3948_v54 = vpop.f32.mrb[9].mxu1 }
 0x960   :  { %v959_v55 = vpop.f32.mrb[8].mxu0 }
 0x961   :  { %v3632_v56 = vmul.f32 -1.442695, %v1071_v53  ;;  %v964_v57 = vrot.slane %v959_v55, 2  ;;  %v3937_v58 = vpop.f32.mrb[9].mxu0 }
 0x963   :  { %4479 = vpow2.f32 %v3632_v56  ;;  %v966_v59 = vadd.f32 %v964_v57, %v4826_v26 }
 0x965   :  { %v3630_v60 = vmul.f32 -1.442695, %v966_v59 }
 0x967   :  { %4481 = vpow2.f32 %v3630_v60 }
 0x968   :  { %4483 = vtanh.f32 %v1071_v53 }
 0x96d   :  { %v4480_v61 = vpop.eup %4479 }
 0x96e   :  { %v1076_v62 = vadd.f32 1.0, %v4480_v61 }
 0x970   :  { %4485 = vrcp.f32 %v1076_v62 }
 0x971   :  { %v4482_v0 = vpop.eup %4481  ;;  %4487 = vtanh.f32 %v966_v59 }
 0x972   :  { %v971_v1 = vadd.f32 1.0, %v4482_v0  ;;  %v4484_v4 = vpop.eup %4483 }
 0x974   :  { %4489 = vrcp.f32 %v971_v1 }
 0x97a   :  { %v4486_v29 = vpop.eup %4485 }
 0x97b   :  { %v1079_v5 = vsel %vm4832_vm5, %v4484_v4, %v4486_v29  ;;  %v4488_v7 = vpop.eup %4487 }
 0x97c   :  { %1085 = vrot.lane.b32.xlu0 %v1079_v5, %s4634_s3  ;;  %v1083_v19 = vmul.f32 %v1081_v18, %v1079_v5 }
 0x97e   :  { %v4490_v8 = vpop.eup %4489 }
 0x97f   :  { %v974_v26 = vsel %vm4832_vm5, %v4488_v7, %v4490_v8 }
 0x980   :  { %980 = vrot.lane.b32.xlu1 %v974_v26, %s4634_s3  ;;  %v978_v25 = vmul.f32 %v976_v21, %v974_v26 }
 0x9ee   :  { %v1086_v9 = vpop.permute.xlu0 %1085 }
 0x9ef   :  { %v1088_v11 = vmul.f32 %v1086_v9, %v1079_v5 }
 0x9f1   :  { %1090 = vrot.lane.b32.xlu0 %v1088_v11, %s4635_s6 }
 0x9f2   :  { %v981_v12 = vpop.permute.xlu1 %980 }
 0x9f3   :  { %v983_v13 = vmul.f32 %v981_v12, %v974_v26 }
 0x9f5   :  { %985 = vrot.lane.b32.xlu1 %v983_v13, %s4635_s6 }
 0xa63   :  { %v1091_v20 = vpop.permute.xlu0 %1090 }
 0xa64   :  { %v4976_v22 = vadd.f32 %v1091_v20, %v1083_v19 }
 0xa66   :  { %4491 = vtanh.f32 %v4976_v22  ;;  %v1293_v4 = vrot.slane %v4976_v22, 2 }
 0xa67   :  { %v986_v27 = vpop.permute.xlu1 %985 }
 0xa68   :  { %v4979_v28 = vadd.f32 %v986_v27, %v978_v25 }
 0xa6a   :  { %4493 = vtanh.f32 %v4979_v28  ;;  %v1186_v7 = vrot.slane %v4979_v28, 6 }
 0xa70   :  { %v4492_v30 = vpop.eup %4491 }
 0xa71   :  { %1096 = vrot.lane.b32.xlu0 %v4492_v30, %s4634_s3 }
 0xa74   :  { %v4494_v31 = vpop.eup %4493 }
 0xa75   :  { %991 = vrot.lane.b32.xlu1 %v4494_v31, %s4634_s3 }
 0xae3   :  { %v1097_v32 = vpop.permute.xlu0 %1096 }
 0xae4   :  { %v4984_v33 = vmul.f32 %v1097_v32, %v1079_v5 }
 0xae6   :  { %1206 = vrot.lane.b32.xlu0 %v4984_v33, %s4635_s6 }
 0xae7   :  { %v992_v34 = vpop.permute.xlu1 %991 }
 0xae8   :  { %v994_v35 = vmul.f32 %v992_v34, %v974_v26 }
 0xaea   :  { %v1101_v36 = vrot.slane %v994_v35, 6  ;;  %v4990_v37 = vsel %vm1959_vm8, %v4947_v49, %v994_v35 }
 0xaec   :  { %1102 = vrot.lane.b32.xlu1 %v1101_v36, %s4635_s6 }
 0xb58   :  { %v1207_v38 = vpop.permute.xlu0 %1206 }
 0xb59   :  { %3969 = vmatmul.mubr.msk.f32.vlgmr.msra.gmra.mrb[10].mxu1 %vm257_vm6, %v1207_v38 }
 0xb5a   :  { %4288 = vmatpush3.bf16.msra.mxu1 %v4771_v10  ;;  %3990 = vmatprep.mubr.msk.f32.mxu1 %vm4632_vm2, %v4633_v17 }
 0xb5b   :  { %4289 = vmatprep.subr.bf16.mxu1 %v4631_v14 }
 0xb5e   :  { %v1103_v39 = vpop.permute.xlu1 %1102  ;;  %4291 = vmatpush3.bf16.msra.mxu1 %v4790_v16 }
 0xb5f   :  { %3958 = vmatmul.mubr.msk.f32.vlgmr.msra.gmra.mrb[10].mxu0 %vm257_vm6, %v1103_v39  ;;  %4298 = vmatprep.subr.bf16.mxu1 %v4631_v14 }
 0xb60   :  { %4282 = vmatpush3.bf16.msra.mxu0 %v4758_v6  ;;  %3979 = vmatprep.mubr.msk.f32.mxu0 %vm4632_vm2, %v4633_v17 }
 0xb61   :  { %4283 = vmatprep.subr.bf16.mxu0 %v4631_v14 }
 0xb64   :  { %4285 = vmatpush3.bf16.msra.mxu0 %v4788_v15 }
 0xb65   :  { %4292 = vmatprep.subr.bf16.mxu0 %v4631_v14 }
 0xc2c   :  { %v1276_v40 = vpop.f32.mrb[10].mxu1 }
 0xc2d   :  { %v1281_v41 = vrot.slane %v1276_v40, 2  ;;  %v3970_v43 = vpop.f32.mrb[11].mxu1 }
 0xc2f   :  { %v1283_v44 = vadd.f32 %v1281_v41, %v4822_v23 }
 0xc31   :  { %v3636_v46 = vmul.f32 -1.442695, %v1283_v44 }
 0xc32   :  { %v1172_v47 = vpop.f32.mrb[10].mxu0 }
 0xc33   :  { %4495 = vpow2.f32 %v3636_v46  ;;  %v1176_v48 = vadd.f32 %v1172_v47, %v4824_v24  ;;  %v3959_v49 = vpop.f32.mrb[11].mxu0 }
 0xc35   :  { %v3634_v50 = vmul.f32 -1.442695, %v1176_v48 }
 0xc37   :  { %4497 = vpow2.f32 %v3634_v50 }
 0xc38   :  { %4499 = vtanh.f32 %v1283_v44 }
 0xc3d   :  { %v4496_v52 = vpop.eup %4495 }
 0xc3e   :  { %v1288_v2 = vadd.f32 1.0, %v4496_v52 }
 0xc40   :  { %4501 = vrcp.f32 %v1288_v2 }
 0xc41   :  { %v4498_v53 = vpop.eup %4497  ;;  %4503 = vtanh.f32 %v1176_v48 }
 0xc42   :  { %v1181_v54 = vadd.f32 1.0, %v4498_v53  ;;  %v4500_v55 = vpop.eup %4499 }
 0xc44   :  { %4505 = vrcp.f32 %v1181_v54 }
 0xc4a   :  { %v4502_v56 = vpop.eup %4501 }
 0xc4b   :  { %v1291_v57 = vsel %vm4832_vm5, %v4500_v55, %v4502_v56  ;;  %v4504_v58 = vpop.eup %4503 }
 0xc4c   :  { %1297 = vrot.lane.b32.xlu0 %v1291_v57, %s4634_s3  ;;  %v1295_v29 = vmul.f32 %v1293_v4, %v1291_v57 }
 0xc4e   :  { %v4506_v59 = vpop.eup %4505 }
 0xc4f   :  { %v1184_v60 = vsel %vm4832_vm5, %v4504_v58, %v4506_v59 }
 0xc50   :  { %1190 = vrot.lane.b32.xlu1 %v1184_v60, %s4634_s3  ;;  %v1188_v26 = vmul.f32 %v1186_v7, %v1184_v60 }
 0xcbe   :  { %v1298_v61 = vpop.permute.xlu0 %1297 }
 0xcbf   :  { %v1300_v62 = vmul.f32 %v1298_v61, %v1291_v57 }
 0xcc1   :  { %1302 = vrot.lane.b32.xlu0 %v1300_v62, %s4635_s6 }
 0xcc2   :  { %v1191_v0 = vpop.permute.xlu1 %1190 }
 0xcc3   :  { %v1193_v1 = vmul.f32 %v1191_v0, %v1184_v60 }
 0xcc5   :  { %1195 = vrot.lane.b32.xlu1 %v1193_v1, %s4635_s6 }
 0xd33   :  { %v1303_v5 = vpop.permute.xlu0 %1302 }
 0xd34   :  { %v5019_v8 = vadd.f32 %v1303_v5, %v1295_v29 }
 0xd36   :  { %4507 = vtanh.f32 %v5019_v8 }
 0xd37   :  { %v1196_v9 = vpop.permute.xlu1 %1195 }
 0xd38   :  { %v5022_v11 = vadd.f32 %v1196_v9, %v1188_v26 }
 0xd3a   :  { %4509 = vtanh.f32 %v5022_v11  ;;  %v1400_v58 = vrot.slane %v5022_v11, 6 }
 0xd40   :  { %v4508_v12 = vpop.eup %4507 }
 0xd41   :  { %1308 = vrot.lane.b32.xlu0 %v4508_v12, %s4634_s3 }
 0xd44   :  { %v4510_v13 = vpop.eup %4509 }
 0xd45   :  { %1201 = vrot.lane.b32.xlu1 %v4510_v13, %s4634_s3 }
 0xdb3   :  { %v1309_v18 = vpop.permute.xlu0 %1308 }
 0xdb4   :  { %v5027_v19 = vmul.f32 %v1309_v18, %v1291_v57  ;;  %v1508_v57 = vrot.slane %v5019_v8, 2 }
 0xdb6   :  { %v1420_v20 = vrot.slane %v5027_v19, 6 }
 0xdb7   :  { %v1202_v21 = vpop.permute.xlu1 %1201 }
 0xdb8   :  { %v5030_v22 = vmul.f32 %v1202_v21, %v1184_v60  ;;  %1421 = vrot.lane.b32.xlu0 %v1420_v20, %s4635_s6 }
 0xdba   :  { %1313 = vrot.lane.b32.xlu1 %v5030_v22, %s4635_s6 }
 0xe2a   :  { %v1422_v25 = vpop.permute.xlu0 %1421 }
 0xe2b   :  { %3991 = vmatmul.mubr.msk.f32.vlgmr.msra.gmra.mrb[12].mxu1 %vm257_vm6, %v1422_v25 }
 0xe2c   :  { %v1314_v27 = vpop.permute.xlu1 %1313  ;;  %4300 = vmatpush3.bf16.msra.mxu1 %v4771_v10  ;;  %4012 = vmatprep.mubr.msk.f32.mxu1 %vm4632_vm2, %v4633_v17 }
 0xe2d   :  { %3980 = vmatmul.mubr.msk.f32.vlgmr.msra.gmra.mrb[12].mxu0 %vm257_vm6, %v1314_v27  ;;  %4301 = vmatprep.subr.bf16.mxu1 %v4631_v14 }
 0xe2e   :  { %4294 = vmatpush3.bf16.msra.mxu0 %v4758_v6  ;;  %4001 = vmatprep.mubr.msk.f32.mxu0 %vm4632_vm2, %v4633_v17 }
 0xe2f   :  { %4295 = vmatprep.subr.bf16.mxu0 %v4631_v14 }
 0xe30   :  { %4303 = vmatpush3.bf16.msra.mxu1 %v4790_v16 }
 0xe31   :  { %4310 = vmatprep.subr.bf16.mxu1 %v4631_v14 }
 0xe32   :  { %4297 = vmatpush3.bf16.msra.mxu0 %v4788_v15 }
 0xe33   :  { %4304 = vmatprep.subr.bf16.mxu0 %v4631_v14 }
 0xefe   :  { %v1491_v28 = vpop.f32.mrb[12].mxu1 }
 0xeff   :  { %v1496_v30 = vrot.slane %v1491_v28, 4  ;;  %v3992_v31 = vpop.f32.mrb[13].mxu1 }
 0xf00   :  { %v1383_v32 = vpop.f32.mrb[12].mxu0 }
 0xf01   :  { %v1498_v34 = vadd.f32 %v1496_v30, %v4822_v23  ;;  %v1388_v35 = vrot.slane %v1383_v32, 6  ;;  %v3981_v36 = vpop.f32.mrb[13].mxu0 }
 0xf03   :  { %v3640_v38 = vmul.f32 -1.442695, %v1498_v34  ;;  %v1390_v39 = vadd.f32 %v1388_v35, %v4824_v24 }
 0xf05   :  { %4511 = vpow2.f32 %v3640_v38  ;;  %v3638_v40 = vmul.f32 -1.442695, %v1390_v39 }
 0xf07   :  { %4513 = vpow2.f32 %v3638_v40 }
 0xf08   :  { %4515 = vtanh.f32 %v1498_v34 }
 0xf0f   :  { %v4512_v41 = vpop.eup %4511 }
 0xf10   :  { %v1503_v43 = vadd.f32 1.0, %v4512_v41 }
 0xf11   :  { %v4514_v44 = vpop.eup %4513 }
 0xf12   :  { %4517 = vrcp.f32 %v1503_v43  ;;  %v1395_v46 = vadd.f32 1.0, %v4514_v44  ;;  %v4516_v47 = vpop.eup %4515 }
 0xf13   :  { %4519 = vtanh.f32 %v1390_v39 }
 0xf14   :  { %4521 = vrcp.f32 %v1395_v46 }
 0xf1c   :  { %v4518_v48 = vpop.eup %4517 }
 0xf1d   :  { %v4520_v49 = vpop.eup %4519  ;;  %v1506_v50 = vsel %vm4832_vm5, %v4516_v47, %v4518_v48 }
 0xf1e   :  { %v4522_v52 = vpop.eup %4521  ;;  %1512 = vrot.lane.b32.xlu0 %v1506_v50, %s4634_s3  ;;  %v1510_v59 = vmul.f32 %v1508_v57, %v1506_v50 }
 0xf1f   :  { %v1398_v2 = vsel %vm4832_vm5, %v4520_v49, %v4522_v52 }
 0xf20   :  { %1404 = vrot.lane.b32.xlu1 %v1398_v2, %s4634_s3  ;;  %v1402_v62 = vmul.f32 %v1400_v58, %v1398_v2 }
 0xf90   :  { %v1513_v53 = vpop.permute.xlu0 %1512 }
 0xf91   :  { %v1515_v54 = vmul.f32 %v1513_v53, %v1506_v50 }
 0xf92   :  { %v1405_v55 = vpop.permute.xlu1 %1404 }
 0xf93   :  { %v1407_v56 = vmul.f32 %v1405_v55, %v1398_v2  ;;  %1517 = vrot.lane.b32.xlu0 %v1515_v54, %s4635_s6 }
 0xf95   :  { %1409 = vrot.lane.b32.xlu1 %v1407_v56, %s4635_s6 }
0x1005   :  { %v1518_v60 = vpop.permute.xlu0 %1517 }
0x1006   :  { %v5061_v61 = vadd.f32 %v1518_v60, %v1510_v59 }
0x1007   :  { %v1410_v0 = vpop.permute.xlu1 %1409 }
0x1008   :  { %4523 = vtanh.f32 %v5061_v61  ;;  %v5064_v1 = vadd.f32 %v1410_v0, %v1402_v62  ;;  %v1724_v48 = vrot.slane %v5061_v61, 2 }
0x100a   :  { %4525 = vtanh.f32 %v5064_v1  ;;  %v1616_v49 = vrot.slane %v5064_v1, 6 }
0x1012   :  { %v4524_v4 = vpop.eup %4523 }
0x1013   :  { %1523 = vrot.lane.b32.xlu0 %v4524_v4, %s4634_s3 }
0x1014   :  { %v4526_v29 = vpop.eup %4525 }
0x1015   :  { %1415 = vrot.lane.b32.xlu1 %v4526_v29, %s4634_s3 }
0x1085   :  { %v1524_v5 = vpop.permute.xlu0 %1523 }
0x1086   :  { %v5069_v7 = vmul.f32 %v1524_v5, %v1506_v50 }
0x1087   :  { %v1416_v8 = vpop.permute.xlu1 %1415 }
0x1088   :  { %v1636_v26 = vrot.slane %v5069_v7, 4  ;;  %v5072_v9 = vmul.f32 %v1416_v8, %v1398_v2 }
0x108a   :  { %v1528_v11 = vrot.slane %v5072_v9, 2  ;;  %1637 = vrot.lane.b32.xlu0 %v1636_v26, %s4635_s6  ;;  %v1961_v0 = vsel %vm1956_vm7, %v5030_v22, %v5072_v9 }
0x108c   :  { %1529 = vrot.lane.b32.xlu1 %v1528_v11, %s4635_s6 }
0x10fc   :  { %v1638_v12 = vpop.permute.xlu0 %1637 }
0x10fd   :  { %4013 = vmatmul.mubr.msk.f32.vlgmr.msra.gmra.mrb[14].mxu1 %vm257_vm6, %v1638_v12 }
0x10fe   :  { %v1530_v13 = vpop.permute.xlu1 %1529  ;;  %4312 = vmatpush3.bf16.msra.mxu1 %v4771_v10  ;;  %4034 = vmatprep.mubr.msk.f32.mxu1 %vm4632_vm2, %v4633_v17 }
0x10ff   :  { %4002 = vmatmul.mubr.msk.f32.vlgmr.msra.gmra.mrb[14].mxu0 %vm257_vm6, %v1530_v13  ;;  %4313 = vmatprep.subr.bf16.mxu1 %v4631_v14 }
0x1100   :  { %4306 = vmatpush3.bf16.msra.mxu0 %v4758_v6  ;;  %4023 = vmatprep.mubr.msk.f32.mxu0 %vm4632_vm2, %v4633_v17 }
0x1101   :  { %4307 = vmatprep.subr.bf16.mxu0 %v4631_v14 }
0x1102   :  { %4315 = vmatpush3.bf16.msra.mxu1 %v4790_v16 }
0x1103   :  { %4332 = vmatprep.subr.bf16.mxu1 %v4631_v14 }
0x1104   :  { %4309 = vmatpush3.bf16.msra.mxu0 %v4788_v15 }
0x11d0   :  { %v1707_v10 = vpop.f32.mrb[14].mxu1 }
0x11d1   :  { %v1712_v18 = vrot.slane %v1707_v10, 6  ;;  %v4014_v20 = vpop.f32.mrb[15].mxu1 }
0x11d2   :  { %v1599_v21 = vpop.f32.mrb[14].mxu0 }
0x11d3   :  { %v1714_v25 = vadd.f32 %v1712_v18, %v4822_v23  ;;  %v1604_v27 = vrot.slane %v1599_v21, 4  ;;  %v4003_v28 = vpop.f32.mrb[15].mxu0 }
0x11d5   :  { %v3644_v6 = vmul.f32 -1.442695, %v1714_v25  ;;  %v1606_v30 = vadd.f32 %v1604_v27, %v4824_v24 }
0x11d7   :  { %4527 = vpow2.f32 %v3644_v6  ;;  %v3642_v31 = vmul.f32 -1.442695, %v1606_v30 }
0x11d9   :  { %4529 = vpow2.f32 %v3642_v31 }
0x11da   :  { %4531 = vtanh.f32 %v1714_v25 }
0x11e1   :  { %v4528_v32 = vpop.eup %4527 }
0x11e2   :  { %v1719_v16 = vadd.f32 1.0, %v4528_v32 }
0x11e3   :  { %v4530_v34 = vpop.eup %4529 }
0x11e4   :  { %4533 = vrcp.f32 %v1719_v16  ;;  %v1611_v15 = vadd.f32 1.0, %v4530_v34  ;;  %v4532_v35 = vpop.eup %4531 }
0x11e5   :  { %4535 = vtanh.f32 %v1606_v30 }
0x11e6   :  { %4537 = vrcp.f32 %v1611_v15 }
0x11ee   :  { %v4534_v36 = vpop.eup %4533 }
0x11ef   :  { %v4536_v38 = vpop.eup %4535  ;;  %v1722_v39 = vsel %vm4832_vm5, %v4532_v35, %v4534_v36 }
0x11f0   :  { %v4538_v40 = vpop.eup %4537  ;;  %1728 = vrot.lane.b32.xlu0 %v1722_v39, %s4634_s3  ;;  %v1726_v50 = vmul.f32 %v1724_v48, %v1722_v39  ;;  %v1976_v48 = vld [vmem:[%s5460_s7 + $0x30] sm:$0xff] }
0x11f1   :  { %v1614_v41 = vsel %vm4832_vm5, %v4536_v38, %v4538_v40 }
0x11f2   :  { %1620 = vrot.lane.b32.xlu1 %v1614_v41, %s4634_s3  ;;  %v1618_v53 = vmul.f32 %v1616_v49, %v1614_v41 }
0x1262   :  { %v1729_v43 = vpop.permute.xlu0 %1728 }
0x1263   :  { %v1731_v44 = vmul.f32 %v1729_v43, %v1722_v39 }
0x1264   :  { %v1621_v46 = vpop.permute.xlu1 %1620 }
0x1265   :  { %v1623_v47 = vmul.f32 %v1621_v46, %v1614_v41  ;;  %1733 = vrot.lane.b32.xlu0 %v1731_v44, %s4635_s6  ;;  %v1974_v46 = vld [vmem:[%s5460_s7 + $0x20] sm:$0xff] }
0x1267   :  { %1625 = vrot.lane.b32.xlu1 %v1623_v47, %s4635_s6  ;;  %v1975_v47 = vld [vmem:[%s5460_s7 + $0x28] sm:$0xff] }
0x1268   :  { %v4316_v49 = vpack.c.bf16 %v1975_v47, %v1974_v46 }
0x126a   :  { %4317 = vmatprep.subr.bf16.mxu0 %v4316_v49 }
0x12d7   :  { %v1734_v52 = vpop.permute.xlu0 %1733 }
0x12d8   :  { %v1736_v2 = vadd.f32 %v1734_v52, %v1726_v50  ;;  %v1977_v50 = vld [vmem:[%s5460_s7 + $0x38] sm:$0xff] }
0x12d9   :  { %v1626_v54 = vpop.permute.xlu1 %1625 }
0x12da   :  { %4539 = vtanh.f32 %v1736_v2  ;;  %v1628_v55 = vadd.f32 %v1626_v54, %v1618_v53  ;;  %v1937_v35 = vrot.slane %v1736_v2, 2  ;;  %v4320_v2 = vpack.c.bf16 %v1977_v50, %v1976_v48 }
0x12db   :  { %v1967_v53 = vsel %vm1956_vm7, %v4984_v33, %v4939_v42  ;;  %v1971_v42 = vld [vmem:[%s5460_s7 + $0x8] sm:$0xff] }
0x12dc   :  { %4541 = vtanh.f32 %v1628_v55 }
0x12e4   :  { %v4540_v56 = vpop.eup %4539 }
0x12e5   :  { %1739 = vrot.lane.b32.xlu0 %v4540_v56, %s4634_s3 }
0x12e6   :  { %v4542_v57 = vpop.eup %4541 }
0x12e7   :  { %1631 = vrot.lane.b32.xlu1 %v4542_v57, %s4634_s3  ;;  %v1970_v57 = vld [vmem:[%s5460_s7] sm:$0xff] }
0x12e8   :  { %v4324_v33 = vpack.c.bf16 %v1971_v42, %v1970_v57 }
0x1357   :  { %v1740_v58 = vpop.permute.xlu0 %1739 }
0x1358   :  { %v5104_v59 = vmul.f32 %v1740_v58, %v1722_v39  ;;  %v1832_v39 = vrot.slane %v1628_v55, 6  ;;  %v1968_v55 = vsel %vm84_vm0, %v1967_v53, %v4897_v51  ;;  %v2157_v51 = vld [vmem:[%s5461_s8] sm:$0xff] }
0x1359   :  { %v1632_v60 = vpop.permute.xlu1 %1631  ;;  %v1969_v56 = vsel %vm1959_vm8, %v1968_v55, %v4852_v63  ;;  %v2158_v63 = vld [vmem:[%s5461_s8 + $0x8] sm:$0xff] }
0x135a   :  { %v1852_v61 = vrot.slane %v5104_v59, 2  ;;  %v1634_v62 = vmul.f32 %v1632_v60, %v1614_v41  ;;  %v5163_v58 = vpack.c.bf16 %v2158_v63, %v2157_v51  ;;  %v2159_v60 = vld [vmem:[%s5461_s8 + $0x10] sm:$0xff] }
0x135c   :  { %v1744_v1 = vrot.slane %v1634_v62, 4  ;;  %1853 = vrot.lane.b32.xlu0 %v1852_v61, %s4635_s6  ;;  %v5112_v4 = vsel %vm84_vm0, %v1961_v0, %v1634_v62  ;;  %v2160_v61 = vld [vmem:[%s5461_s8 + $0x18] sm:$0xff] }
0x135d   :  { %v5173_v0 = vpack.c.bf16 %v2160_v61, %v2159_v60 }
0x135e   :  { %1745 = vrot.lane.b32.xlu1 %v1744_v1, %s4635_s6 }
0x13ce   :  { %v1854_v29 = vpop.permute.xlu0 %1853 }
0x13cf   :  { %4035 = vmatmul.mubr.msk.f32.vlgmr.msra.gmra.mrb[16].mxu1 %vm257_vm6, %v1854_v29 }
0x13d0   :  { %v1746_v5 = vpop.permute.xlu1 %1745  ;;  %4067 = vmatprep.mubr.msk.f32.mxu1 %vm4632_vm2, %v4633_v17  ;;  %4334 = vmatpush3.bf16.msra.mxu1 %v5163_v58 }
0x13d1   :  { %4024 = vmatmul.mubr.msk.f32.vlgmr.msra.gmra.mrb[16].mxu0 %vm257_vm6, %v1746_v5  ;;  %4335 = vmatprep.subr.bf16.mxu1 %v4631_v14 }
0x13d2   :  { %4319 = vmatpush3.bf16.msra.mxu0 %v4316_v49 }
0x13d3   :  { %4321 = vmatprep.subr.bf16.mxu0 %v4320_v2 }
0x13d4   :  { %4337 = vmatpush3.bf16.msra.mxu1 %v5173_v0 }
0x13d5   :  { %4338 = vmatprep.subr.bf16.mxu1 %v4631_v14 }
0x13d6   :  { %4323 = vmatpush3.bf16.msra.mxu0 %v4320_v2 }
0x13d7   :  { %4325 = vmatprep.subr.bf16.mxu0 %v4324_v33  ;;  %4068 = vmatmul.mubr.f32.vlgmr.msra.gmra.mrb[18].mxu1 %v4633_v17 }
0x13d8   :  { %4340 = vmatpush3.bf16.msra.mxu1 %v5163_v58  ;;  %4078 = vmatprep.mubr.msk.f32.mxu1 %vm4632_vm2, %v4633_v17 }
0x13d9   :  { %4341 = vmatprep.subr.bf16.mxu1 %v4631_v14 }
0x13dc   :  { %4343 = vmatpush3.bf16.msra.mxu1 %v5173_v0 }
0x13dd   :  { %4350 = vmatprep.subr.bf16.mxu1 %v4631_v14 }
0x14a2   :  { %v1923_v8 = vpop.f32.mrb[16].mxu1 }
0x14a3   :  { %v1927_v22 = vadd.f32 %v1923_v8, %v4822_v23  ;;  %v4036_v26 = vpop.f32.mrb[17].mxu1 }
0x14a4   :  { %v1815_v9 = vpop.f32.mrb[16].mxu0 }
0x14a5   :  { %v3648_v11 = vmul.f32 -1.442695, %v1927_v22  ;;  %v1820_v12 = vrot.slane %v1815_v9, 2  ;;  %v4025_v13 = vpop.f32.mrb[17].mxu0 }
0x14a7   :  { %4543 = vpow2.f32 %v3648_v11  ;;  %v1822_v10 = vadd.f32 %v1820_v12, %v4824_v24 }
0x14a9   :  { %v3646_v18 = vmul.f32 -1.442695, %v1822_v10 }
0x14aa   :  { %v2227_v13 = vpop.f32.mrb[18].mxu1 }
0x14ab   :  { %4545 = vpow2.f32 %v3646_v18  ;;  %v3653_v18 = vld [vmem:[%s5462_s9] ss:$0 sm:$0xff] }
0x14ac   :  { %4547 = vtanh.f32 %v1927_v22 }
0x14b1   :  { %v4544_v20 = vpop.eup %4543 }
0x14b2   :  { %v1932_v21 = vadd.f32 1.0, %v4544_v20 }
0x14b4   :  { %4549 = vrcp.f32 %v1932_v21 }
0x14b5   :  { %v4546_v25 = vpop.eup %4545  ;;  %4551 = vtanh.f32 %v1822_v10  ;;  %v4069_v10 = vpop.f32.mrb[19].mxu1 }
0x14b6   :  { %v1827_v27 = vadd.f32 1.0, %v4546_v25  ;;  %v4548_v28 = vpop.eup %4547 }
0x14b8   :  { %4553 = vrcp.f32 %v1827_v27 }
0x14be   :  { %v4550_v23 = vpop.eup %4549 }
0x14bf   :  { %v1935_v6 = vsel %vm4832_vm5, %v4548_v28, %v4550_v23  ;;  %v4552_v30 = vpop.eup %4551 }
0x14c0   :  { %1941 = vrot.lane.b32.xlu0 %v1935_v6, %s4634_s3  ;;  %v1939_v36 = vmul.f32 %v1937_v35, %v1935_v6 }
0x14c2   :  { %v4554_v31 = vpop.eup %4553 }
0x14c3   :  { %v1830_v24 = vsel %vm4832_vm5, %v4552_v30, %v4554_v31 }
0x14c4   :  { %1836 = vrot.lane.b32.xlu1 %v1830_v24, %s4634_s3  ;;  %v1834_v41 = vmul.f32 %v1832_v39, %v1830_v24 }
0x1532   :  { %v1942_v32 = vpop.permute.xlu0 %1941 }
0x1533   :  { %v1944_v16 = vmul.f32 %v1942_v32, %v1935_v6 }
0x1535   :  { %1946 = vrot.lane.b32.xlu0 %v1944_v16, %s4635_s6 }
0x1536   :  { %v1837_v34 = vpop.permute.xlu1 %1836 }
0x1537   :  { %v1839_v15 = vmul.f32 %v1837_v34, %v1830_v24 }
0x1539   :  { %1841 = vrot.lane.b32.xlu1 %v1839_v15, %s4635_s6 }
0x15a7   :  { %v1947_v38 = vpop.permute.xlu0 %1946 }
0x15a8   :  { %v1949_v40 = vadd.f32 %v1947_v38, %v1939_v36 }
0x15aa   :  { %4555 = vtanh.f32 %v1949_v40 }
0x15ab   :  { %v1842_v43 = vpop.permute.xlu1 %1841 }
0x15ac   :  { %v1844_v44 = vadd.f32 %v1842_v43, %v1834_v41 }
0x15ae   :  { %4557 = vtanh.f32 %v1844_v44 }
0x15b4   :  { %v4556_v52 = vpop.eup %4555 }
0x15b5   :  { %1952 = vrot.lane.b32.xlu0 %v4556_v52, %s4634_s3 }
0x15b8   :  { %v4558_v54 = vpop.eup %4557 }
0x15b9   :  { %1847 = vrot.lane.b32.xlu1 %v4558_v54, %s4634_s3 }
0x15bd   :  { %1982 = vrot.lane.b32.xlu1 %v1969_v56, %s4635_s6 }
0x1627   :  { %v1953_v62 = vpop.permute.xlu0 %1952 }
0x1628   :  { %v1955_v1 = vmul.f32 %v1953_v62, %v1935_v6 }
0x162a   :  { %v1964_v29 = vsel %vm1956_vm7, %v1955_v1, %v5104_v59 }
0x162b   :  { %v1848_v5 = vpop.permute.xlu1 %1847  ;;  %v1965_v8 = vsel %vm84_vm0, %v1964_v29, %v5069_v7  ;;  %v1973_v7 = vld [vmem:[%s5460_s7 + $0x18] sm:$0xff] }
0x162c   :  { %v5181_v22 = vmul.f32 %v1848_v5, %v1830_v24  ;;  %v1966_v26 = vsel %vm1959_vm8, %v1965_v8, %v5027_v19  ;;  %v1972_v19 = vld [vmem:[%s5460_s7 + $0x10] sm:$0xff] }
0x162d   :  { %1980 = vrot.lane.b32.xlu0 %v1966_v26, %s4635_s6  ;;  %v4328_v9 = vpack.c.bf16 %v1973_v7, %v1972_v19 }
0x162e   :  { %v1963_v59 = vsel %vm1959_vm8, %v5112_v4, %v5181_v22 }
0x162f   :  { %2067 = vrot.lane.b32.xlu1 %v1963_v59, %s4635_s6  ;;  %v1983_v11 = vpop.permute.xlu1 %1982 }
0x1631   :  { %2065 = vrot.lane.b32.xlu0 %v4990_v37, %s4635_s6 }
0x169f   :  { %v1981_v4 = vpop.permute.xlu0 %1980 }
0x16a0   :  { %4045 = vmatprep.mubr.msk.f32.mxu0 %vm257_vm6, %v1981_v4 }
0x16a1   :  { %4046 = vmatmul.mubr.msk.f32.vlgmr.msra.gmra.mrb[18].mxu0 %vm257_vm6, %v1983_v11  ;;  %v2068_v12 = vpop.permute.xlu1 %2067 }
0x16a2   :  { %4327 = vmatpush3.bf16.msra.mxu0 %v4324_v33 }
0x16a3   :  { %v2066_v37 = vpop.permute.xlu0 %2065  ;;  %4329 = vmatprep.subr.bf16.mxu0 %v4328_v9 }
0x16a4   :  { %4056 = vmatprep.mubr.msk.f32.mxu0 %vm257_vm6, %v2066_v37 }
0x16a6   :  { %4331 = vmatpush3.bf16.msra.mxu0 %v4328_v9 }
0x16a7   :  { %4344 = vmatprep.subr.bf16.mxu0 %v4631_v14 }
0x16a9   :  { %4057 = vmatmul.mubr.msk.f32.vlgmr.msra.gmra.mrb[18].mxu0 %vm257_vm6, %v2068_v12 }
0x16aa   :  { %4346 = vmatpush3.bf16.msra.mxu0 %v5163_v58  ;;  %4089 = vmatprep.mubr.msk.f32.mxu0 %vm4632_vm2, %v4633_v17 }
0x16ab   :  { %4347 = vmatprep.subr.bf16.mxu0 %v4631_v14 }
0x16ae   :  { %4349 = vmatpush3.bf16.msra.mxu0 %v5173_v0 }
0x16af   :  { %4356 = vmatprep.subr.bf16.mxu0 %v4631_v14 }
0x177c   :  { %v4058_v20 = vpop.f32.mrb[18].mxu0 }
0x177d   :  { %v5219_v21 = vadd.f32 %v4058_v20, %v3653_v18  ;;  %v2139_v25 = vpop.f32.mrb[19].mxu0 }
0x177e   :  { %v5221_v27 = vadd.f32 %v3653_v18, %v2139_v25 }
0x1780   :  { %v2231_v28 = vadd.f32 %v2227_v13, %v5221_v27 }
0x1782   :  { %v3654_v23 = vmul.f32 -1.442695, %v2231_v28 }
0x1784   :  { %4559 = vpow2.f32 %v3654_v23 }
0x1785   :  { %4561 = vtanh.f32 %v2231_v28 }
0x178e   :  { %v4560_v6 = vpop.eup %4559 }
0x178f   :  { %v2236_v30 = vadd.f32 1.0, %v4560_v6  ;;  %v4562_v31 = vpop.eup %4561 }
0x1791   :  { %4563 = vrcp.f32 %v2236_v30 }
0x179b   :  { %v4564_v24 = vpop.eup %4563 }
0x179c   :  { %v2239_v32 = vsel %vm4832_vm5, %v4562_v31, %v4564_v24 }
0x179d   :  { %2242 = vrot.lane.b32.xlu0 %v2239_v32, %s4634_s3  ;;  %v2240_v15 = vmul.f32 0.0, %v2239_v32 }
0x180f   :  { %v2243_v16 = vpop.permute.xlu0 %2242 }
0x1810   :  { %v2245_v34 = vmul.f32 %v2243_v16, %v2239_v32 }
0x1812   :  { %2247 = vrot.lane.b32.xlu1 %v2245_v34, %s4635_s6 }
0x1884   :  { %v2248_v35 = vpop.permute.xlu1 %2247 }
0x1885   :  { %v2250_v36 = vadd.f32 %v2248_v35, %v2240_v15 }
0x1887   :  { %4565 = vtanh.f32 %v2250_v36  ;;  %v2345_v56 = vrot.slane %v2250_v36, 6 }
0x1891   :  { %v4566_v38 = vpop.eup %4565 }
0x1892   :  { %2253 = vrot.lane.b32.xlu0 %v4566_v38, %s4634_s3 }
0x1904   :  { %v2254_v39 = vpop.permute.xlu0 %2253 }
0x1905   :  { %v2256_v40 = vmul.f32 %v2254_v39, %v2239_v32 }
0x1907   :  { %2258 = vrot.lane.b32.xlu1 %v2256_v40, %s4635_s6 }
0x1979   :  { %v2259_v41 = vpop.permute.xlu1 %2258 }
0x197a   :  { %4079 = vmatmul.mubr.msk.f32.vlgmr.msra.gmra.mrb[20].mxu1 %vm257_vm6, %v2259_v41 }
0x197b   :  { %4352 = vmatpush3.bf16.msra.mxu1 %v5163_v58  ;;  %4100 = vmatprep.mubr.msk.f32.mxu1 %vm4632_vm2, %v4633_v17 }
0x197c   :  { %4353 = vmatprep.subr.bf16.mxu1 %v4631_v14 }
0x197f   :  { %4355 = vmatpush3.bf16.msra.mxu1 %v5173_v0 }
0x1980   :  { %4362 = vmatprep.subr.bf16.mxu1 %v4631_v14 }
0x1a4d   :  { %v2328_v43 = vpop.f32.mrb[20].mxu1 }
0x1a4e   :  { %v2333_v44 = vrot.slane %v2328_v43, 6  ;;  %v4080_v46 = vpop.f32.mrb[21].mxu1 }
0x1a50   :  { %v2335_v47 = vadd.f32 %v2333_v44, %v5221_v27 }
0x1a52   :  { %v3656_v48 = vmul.f32 -1.442695, %v2335_v47 }
0x1a54   :  { %4567 = vpow2.f32 %v3656_v48 }
0x1a55   :  { %4569 = vtanh.f32 %v2335_v47 }
0x1a5e   :  { %v4568_v49 = vpop.eup %4567 }
0x1a5f   :  { %v2340_v50 = vadd.f32 1.0, %v4568_v49  ;;  %v4570_v52 = vpop.eup %4569 }
0x1a61   :  { %4571 = vrcp.f32 %v2340_v50 }
0x1a6b   :  { %v4572_v2 = vpop.eup %4571 }
0x1a6c   :  { %v2343_v53 = vsel %vm4832_vm5, %v4570_v52, %v4572_v2 }
0x1a6d   :  { %2349 = vrot.lane.b32.xlu0 %v2343_v53, %s4634_s3  ;;  %v2347_v57 = vmul.f32 %v2345_v56, %v2343_v53 }
0x1adf   :  { %v2350_v54 = vpop.permute.xlu0 %2349 }
0x1ae0   :  { %v2352_v55 = vmul.f32 %v2350_v54, %v2343_v53 }
0x1ae2   :  { %2354 = vrot.lane.b32.xlu1 %v2352_v55, %s4635_s6 }
0x1b54   :  { %v2355_v42 = vpop.permute.xlu1 %2354 }
0x1b55   :  { %v2357_v33 = vadd.f32 %v2355_v42, %v2347_v57 }
0x1b57   :  { %4573 = vtanh.f32 %v2357_v33  ;;  %v2453_v12 = vrot.slane %v2357_v33, 6 }
0x1b61   :  { %v4574_v51 = vpop.eup %4573 }
0x1b62   :  { %2360 = vrot.lane.b32.xlu0 %v4574_v51, %s4634_s3 }
0x1bd4   :  { %v2361_v63 = vpop.permute.xlu0 %2360 }
0x1bd5   :  { %v2363_v60 = vmul.f32 %v2361_v63, %v2343_v53 }
0x1bd7   :  { %v2365_v61 = vrot.slane %v2363_v60, 2 }
0x1bd9   :  { %2366 = vrot.lane.b32.xlu1 %v2365_v61, %s4635_s6 }
0x1c4b   :  { %v2367_v62 = vpop.permute.xlu1 %2366 }
0x1c4c   :  { %4090 = vmatmul.mubr.msk.f32.vlgmr.msra.gmra.mrb[20].mxu0 %vm257_vm6, %v2367_v62 }
0x1c4d   :  { %4358 = vmatpush3.bf16.msra.mxu0 %v5163_v58  ;;  %4111 = vmatprep.mubr.msk.f32.mxu0 %vm4632_vm2, %v4633_v17 }
0x1c4e   :  { %4359 = vmatprep.subr.bf16.mxu0 %v4631_v14 }
0x1c51   :  { %4361 = vmatpush3.bf16.msra.mxu0 %v5173_v0 }
0x1c52   :  { %4368 = vmatprep.subr.bf16.mxu0 %v4631_v14 }
0x1d1f   :  { %v2436_v1 = vpop.f32.mrb[20].mxu0 }
0x1d20   :  { %v2441_v29 = vrot.slane %v2436_v1, 4  ;;  %v4091_v5 = vpop.f32.mrb[21].mxu0 }
0x1d22   :  { %v2443_v8 = vadd.f32 %v2441_v29, %v5221_v27 }
0x1d24   :  { %v3658_v26 = vmul.f32 -1.442695, %v2443_v8 }
0x1d26   :  { %4575 = vpow2.f32 %v3658_v26 }
0x1d27   :  { %4577 = vtanh.f32 %v2443_v8 }
0x1d30   :  { %v4576_v59 = vpop.eup %4575 }
0x1d31   :  { %v2448_v19 = vadd.f32 1.0, %v4576_v59  ;;  %v4578_v7 = vpop.eup %4577 }
0x1d33   :  { %4579 = vrcp.f32 %v2448_v19 }
0x1d3d   :  { %v4580_v4 = vpop.eup %4579 }
0x1d3e   :  { %v2451_v9 = vsel %vm4832_vm5, %v4578_v7, %v4580_v4 }
0x1d3f   :  { %2457 = vrot.lane.b32.xlu0 %v2451_v9, %s4634_s3  ;;  %v2455_v13 = vmul.f32 %v2453_v12, %v2451_v9 }
0x1db1   :  { %v2458_v11 = vpop.permute.xlu0 %2457 }
0x1db2   :  { %v2460_v37 = vmul.f32 %v2458_v11, %v2451_v9 }
0x1db4   :  { %2462 = vrot.lane.b32.xlu1 %v2460_v37, %s4635_s6 }
0x1e26   :  { %v2463_v10 = vpop.permute.xlu1 %2462 }
0x1e27   :  { %v2465_v18 = vadd.f32 %v2463_v10, %v2455_v13 }
0x1e29   :  { %4581 = vtanh.f32 %v2465_v18  ;;  %v2561_v41 = vrot.slane %v2465_v18, 6 }
0x1e33   :  { %v4582_v20 = vpop.eup %4581 }
0x1e34   :  { %2468 = vrot.lane.b32.xlu0 %v4582_v20, %s4634_s3 }
0x1ea6   :  { %v2469_v25 = vpop.permute.xlu0 %2468 }
0x1ea7   :  { %v2471_v28 = vmul.f32 %v2469_v25, %v2451_v9 }
0x1ea9   :  { %v2473_v23 = vrot.slane %v2471_v28, 4 }
0x1eab   :  { %2474 = vrot.lane.b32.xlu1 %v2473_v23, %s4635_s6 }
0x1f1d   :  { %v2475_v6 = vpop.permute.xlu1 %2474 }
0x1f1e   :  { %4101 = vmatmul.mubr.msk.f32.vlgmr.msra.gmra.mrb[22].mxu1 %vm257_vm6, %v2475_v6 }
0x1f1f   :  { %4364 = vmatpush3.bf16.msra.mxu1 %v5163_v58  ;;  %4122 = vmatprep.mubr.msk.f32.mxu1 %vm4632_vm2, %v4633_v17 }
0x1f20   :  { %4365 = vmatprep.subr.bf16.mxu1 %v4631_v14 }
0x1f23   :  { %4367 = vmatpush3.bf16.msra.mxu1 %v5173_v0 }
0x1f24   :  { %4374 = vmatprep.subr.bf16.mxu1 %v4631_v14 }
0x1ff1   :  { %v2544_v30 = vpop.f32.mrb[22].mxu1 }
0x1ff2   :  { %v2549_v31 = vrot.slane %v2544_v30, 2  ;;  %v4102_v24 = vpop.f32.mrb[23].mxu1 }
0x1ff3   :  { %v3012_v24 = vld [vmem:[%s5463_s10 + $0x20] sm:$0xff] }
0x1ff4   :  { %v2551_v32 = vadd.f32 %v2549_v31, %v5221_v27 }
0x1ff6   :  { %v3660_v16 = vmul.f32 -1.442695, %v2551_v32 }
0x1ff8   :  { %4583 = vpow2.f32 %v3660_v16 }
0x1ff9   :  { %4585 = vtanh.f32 %v2551_v32  ;;  %v3013_v32 = vld [vmem:[%s5463_s10 + $0x28] sm:$0xff] }
0x1ffa   :  { %v4381_v16 = vpack.c.bf16 %v3013_v32, %v3012_v24 }
0x2002   :  { %v4584_v34 = vpop.eup %4583 }
0x2003   :  { %v2556_v15 = vadd.f32 1.0, %v4584_v34  ;;  %v4586_v35 = vpop.eup %4585  ;;  %v3014_v34 = vld [vmem:[%s5463_s10 + $0x30] sm:$0xff] }
0x2005   :  { %4587 = vrcp.f32 %v2556_v15  ;;  %v3015_v15 = vld [vmem:[%s5463_s10 + $0x38] sm:$0xff] }
0x200f   :  { %v4588_v36 = vpop.eup %4587 }
0x2010   :  { %v2559_v38 = vsel %vm4832_vm5, %v4586_v35, %v4588_v36  ;;  %v4384_v36 = vpack.c.bf16 %v3015_v15, %v3014_v34 }
0x2011   :  { %2565 = vrot.lane.b32.xlu0 %v2559_v38, %s4634_s3  ;;  %v2563_v43 = vmul.f32 %v2561_v41, %v2559_v38 }
0x2083   :  { %v2566_v39 = vpop.permute.xlu0 %2565 }
0x2084   :  { %v2568_v40 = vmul.f32 %v2566_v39, %v2559_v38 }
0x2086   :  { %2570 = vrot.lane.b32.xlu1 %v2568_v40, %s4635_s6 }
0x20f8   :  { %v2571_v27 = vpop.permute.xlu1 %2570 }
0x20f9   :  { %v2573_v44 = vadd.f32 %v2571_v27, %v2563_v43 }
0x20fb   :  { %4589 = vtanh.f32 %v2573_v44  ;;  %v2666_v60 = vrot.slane %v2573_v44, 6 }
0x2105   :  { %v4590_v46 = vpop.eup %4589 }
0x2106   :  { %2576 = vrot.lane.b32.xlu0 %v4590_v46, %s4634_s3  ;;  %v3008_v46 = vld [vmem:[%s5463_s10] sm:$0xff] }
0x2178   :  { %v2577_v47 = vpop.permute.xlu0 %2576 }
0x2179   :  { %v2579_v48 = vmul.f32 %v2577_v47, %v2559_v38 }
0x217b   :  { %v2581_v49 = vrot.slane %v2579_v48, 6 }
0x217d   :  { %2582 = vrot.lane.b32.xlu1 %v2581_v49, %s4635_s6 }
0x21ef   :  { %v2583_v50 = vpop.permute.xlu1 %2582 }
0x21f0   :  { %4112 = vmatmul.mubr.msk.f32.vlgmr.msra.gmra.mrb[22].mxu0 %vm257_vm6, %v2583_v50 }
0x21f1   :  { %4370 = vmatpush3.bf16.msra.mxu0 %v5163_v58  ;;  %4133 = vmatprep.mubr.msk.f32.mxu0 %vm4632_vm2, %v4633_v17 }
0x21f2   :  { %4371 = vmatprep.subr.bf16.mxu0 %v4631_v14 }
0x21f5   :  { %4373 = vmatpush3.bf16.msra.mxu0 %v5173_v0 }
0x21f6   :  { %4380 = vmatprep.subr.bf16.mxu0 %v4631_v14 }
0x22c3   :  { %v2652_v52 = vpop.f32.mrb[22].mxu0 }
0x22c4   :  { %v2656_v2 = vadd.f32 %v2652_v52, %v5219_v21  ;;  %v4113_v53 = vpop.f32.mrb[23].mxu0  ;;  %v3010_v52 = vld [vmem:[%s5463_s10 + $0x10] sm:$0xff] }
0x22c6   :  { %v3662_v54 = vmul.f32 -1.442695, %v2656_v2 }
0x22c8   :  { %4591 = vpow2.f32 %v3662_v54 }
0x22c9   :  { %4593 = vtanh.f32 %v2656_v2  ;;  %v3011_v2 = vld [vmem:[%s5463_s10 + $0x18] sm:$0xff] }
0x22ca   :  { %v4390_v53 = vpack.c.bf16 %v3011_v2, %v3010_v52 }
0x22d2   :  { %v4592_v55 = vpop.eup %4591 }
0x22d3   :  { %v2661_v56 = vadd.f32 1.0, %v4592_v55  ;;  %v4594_v57 = vpop.eup %4593 }
0x22d5   :  { %4595 = vrcp.f32 %v2661_v56  ;;  %v3087_v56 = vrot.slane %v5181_v22, 6  ;;  %v3172_v22 = vld [vmem:[%s5464_s11 + $0x10] sm:$0xff] }
0x22df   :  { %v4596_v42 = vpop.eup %4595 }
0x22e0   :  { %v2664_v33 = vsel %vm4832_vm5, %v4594_v57, %v4596_v42 }
0x22e1   :  { %2670 = vrot.lane.b32.xlu0 %v2664_v33, %s4634_s3  ;;  %v2668_v61 = vmul.f32 %v2666_v60, %v2664_v33 }
0x2353   :  { %v2671_v51 = vpop.permute.xlu0 %2670 }
0x2354   :  { %v2673_v63 = vmul.f32 %v2671_v51, %v2664_v33  ;;  %v3171_v51 = vld [vmem:[%s5464_s11 + $0x8] sm:$0xff] }
0x2356   :  { %2675 = vrot.lane.b32.xlu1 %v2673_v63, %s4635_s6 }
0x23c8   :  { %v2676_v62 = vpop.permute.xlu1 %2675 }
0x23c9   :  { %v2678_v1 = vadd.f32 %v2676_v62, %v2668_v61  ;;  %v3173_v62 = vld [vmem:[%s5464_s11 + $0x18] sm:$0xff] }
0x23cb   :  { %4597 = vtanh.f32 %v2678_v1  ;;  %v2773_v18 = vrot.slane %v2678_v1, 6 }
0x23d5   :  { %v4598_v29 = vpop.eup %4597 }
0x23d6   :  { %2681 = vrot.lane.b32.xlu0 %v4598_v29, %s4634_s3  ;;  %v4396_v29 = vpack.c.bf16 %v3173_v62, %v3172_v22  ;;  %v3438_v62 = vld [vmem:[%s5467_s15] sm:$0xff] }
0x2448   :  { %v2682_v5 = vpop.permute.xlu0 %2681 }
0x2449   :  { %v2684_v8 = vmul.f32 %v2682_v5, %v2664_v33  ;;  %v3170_v33 = vld [vmem:[%s5464_s11] sm:$0xff] }
0x244a   :  { %v4393_v61 = vpack.c.bf16 %v3171_v51, %v3170_v33 }
0x244b   :  { %2686 = vrot.lane.b32.xlu1 %v2684_v8, %s4635_s6 }
0x24bd   :  { %v2687_v26 = vpop.permute.xlu1 %2686 }
0x24be   :  { %4123 = vmatmul.mubr.msk.f32.vlgmr.msra.gmra.mrb[24].mxu1 %vm257_vm6, %v2687_v26 }
0x24bf   :  { %4376 = vmatpush3.bf16.msra.mxu1 %v5163_v58  ;;  %4144 = vmatprep.mubr.msk.f32.mxu1 %vm4632_vm2, %v4633_v17 }
0x24c0   :  { %4377 = vmatprep.subr.bf16.mxu1 %v4631_v14 }
0x24c3   :  { %4379 = vmatpush3.bf16.msra.mxu1 %v5173_v0 }
0x24c4   :  { %4398 = vmatprep.subr.bf16.mxu1 %v4631_v14 }
0x2591   :  { %v2756_v59 = vpop.f32.mrb[24].mxu1 }
0x2592   :  { %v2761_v19 = vrot.slane %v2756_v59, 6  ;;  %v4124_v7 = vpop.f32.mrb[25].mxu1 }
0x2594   :  { %v2763_v4 = vadd.f32 %v2761_v19, %v5219_v21  ;;  %v3671_v19 = vld [vmem:[%s5465_s12] ss:$0 sm:$0xff] }
0x2596   :  { %v3664_v9 = vmul.f32 -1.442695, %v2763_v4 }
0x2598   :  { %4599 = vpow2.f32 %v3664_v9 }
0x2599   :  { %4601 = vtanh.f32 %v2763_v4 }
0x25a2   :  { %v4600_v11 = vpop.eup %4599 }
0x25a3   :  { %v2768_v37 = vadd.f32 1.0, %v4600_v11  ;;  %v4602_v58 = vpop.eup %4601 }
0x25a5   :  { %4603 = vrcp.f32 %v2768_v37 }
0x25af   :  { %v4604_v12 = vpop.eup %4603 }
0x25b0   :  { %v2771_v13 = vsel %vm4832_vm5, %v4602_v58, %v4604_v12 }
0x25b1   :  { %2777 = vrot.lane.b32.xlu0 %v2771_v13, %s4634_s3  ;;  %v2775_v20 = vmul.f32 %v2773_v18, %v2771_v13 }
0x2623   :  { %v2778_v0 = vpop.permute.xlu0 %2777 }
0x2624   :  { %v2780_v10 = vmul.f32 %v2778_v0, %v2771_v13 }
0x2626   :  { %2782 = vrot.lane.b32.xlu1 %v2780_v10, %s4635_s6 }
0x2698   :  { %v2783_v25 = vpop.permute.xlu1 %2782 }
0x2699   :  { %v2785_v28 = vadd.f32 %v2783_v25, %v2775_v20 }
0x269b   :  { %4605 = vtanh.f32 %v2785_v28  ;;  %v2881_v57 = vrot.slane %v2785_v28, 6 }
0x26a5   :  { %v4606_v23 = vpop.eup %4605 }
0x26a6   :  { %2788 = vrot.lane.b32.xlu0 %v4606_v23, %s4634_s3 }
0x2718   :  { %v2789_v6 = vpop.permute.xlu0 %2788 }
0x2719   :  { %v2791_v30 = vmul.f32 %v2789_v6, %v2771_v13 }
0x271b   :  { %v2793_v31 = vrot.slane %v2791_v30, 2 }
0x271d   :  { %2794 = vrot.lane.b32.xlu1 %v2793_v31, %s4635_s6 }
0x278f   :  { %v2795_v35 = vpop.permute.xlu1 %2794 }
0x2790   :  { %4134 = vmatmul.mubr.msk.f32.vlgmr.msra.gmra.mrb[24].mxu0 %vm257_vm6, %v2795_v35 }
0x2791   :  { %4382 = vmatpush3.bf16.msra.mxu0 %v4381_v16  ;;  %4155 = vmatprep.mubr.msk.f32.mxu0 %vm4632_vm2, %v4633_v17 }
0x2792   :  { %4383 = vmatprep.subr.bf16.mxu0 %v4631_v14 }
0x2795   :  { %4385 = vmatpush3.bf16.msra.mxu0 %v4384_v36 }
0x2796   :  { %4386 = vmatprep.subr.bf16.mxu0 %v4631_v14 }
0x2798   :  { %4156 = vmatmul.mubr.msk.f32.vlgmr.msra.gmra.mrb[26].mxu0 %vm257_vm6, %v4860_v3  ;;  %v3009_v3 = vld [vmem:[%s5463_s10 + $0x8] sm:$0xff] }
0x2799   :  { %4166 = vmatprep.mubr.msk.f32.mxu0 %vm4632_vm2, %v4633_v17  ;;  %v4387_v47 = vpack.c.bf16 %v3009_v3, %v3008_v46 }
0x279b   :  { %4388 = vmatpush3.bf16.msra.mxu0 %v4387_v47 }
0x279c   :  { %4389 = vmatprep.subr.bf16.mxu0 %v4631_v14 }
0x279f   :  { %4391 = vmatpush3.bf16.msra.mxu0 %v4390_v53  ;;  %v3270_v53 = vld [vmem:[%s5466_s13] sm:$0xff] }
0x27a0   :  { %4392 = vmatprep.subr.bf16.mxu0 %v4631_v14 }
0x2863   :  { %v2864_v38 = vpop.f32.mrb[24].mxu0 }
0x2864   :  { %v2869_v39 = vrot.slane %v2864_v38, 4  ;;  %v4135_v40 = vpop.f32.mrb[25].mxu0 }
0x2866   :  { %v2871_v41 = vadd.f32 %v2869_v39, %v5219_v21  ;;  %v3275_v39 = vld [vmem:[%s5466_s13 + $0x28] sm:$0xff] }
0x2868   :  { %v3666_v43 = vmul.f32 -1.442695, %v2871_v41 }
0x286a   :  { %4607 = vpow2.f32 %v3666_v43 }
0x286b   :  { %4609 = vtanh.f32 %v2871_v41  ;;  %v3277_v41 = vld [vmem:[%s5466_s13 + $0x38] sm:$0xff] }
0x286c   :  { %v4402_v43 = vpack.c.bf16 %v3277_v41, %v3276_v45 }
0x2874   :  { %v4608_v27 = vpop.eup %4607 }
0x2875   :  { %v2876_v44 = vadd.f32 1.0, %v4608_v27  ;;  %v4610_v48 = vpop.eup %4609 }
0x2877   :  { %4611 = vrcp.f32 %v2876_v44 }
0x2881   :  { %v4612_v49 = vpop.eup %4611 }
0x2882   :  { %v2879_v50 = vsel %vm4832_vm5, %v4610_v48, %v4612_v49 }
0x2883   :  { %2885 = vrot.lane.b32.xlu0 %v2879_v50, %s4634_s3  ;;  %v2883_v42 = vmul.f32 %v2881_v57, %v2879_v50  ;;  %v3273_v57 = vld [vmem:[%s5466_s13 + $0x18] sm:$0xff] }
0x28f5   :  { %v2886_v54 = vpop.permute.xlu0 %2885 }
0x28f6   :  { %v2888_v55 = vmul.f32 %v2886_v54, %v2879_v50  ;;  %v3271_v54 = vld [vmem:[%s5466_s13 + $0x8] sm:$0xff] }
0x28f8   :  { %2890 = vrot.lane.b32.xlu1 %v2888_v55, %s4635_s6  ;;  %v3272_v55 = vld [vmem:[%s5466_s13 + $0x10] sm:$0xff] }
0x28fc   :  { %3088 = vrot.lane.b32.xlu1 %v3087_v56, %s4635_s6  ;;  %v4405_v56 = vpack.c.bf16 %v3271_v54, %v3270_v53 }
0x296a   :  { %v2891_v63 = vpop.permute.xlu1 %2890 }
0x296b   :  { %v5348_v60 = vadd.f32 %v2891_v63, %v2883_v42  ;;  %v4408_v42 = vpack.c.bf16 %v3273_v57, %v3272_v55 }
0x296d   :  { %4613 = vtanh.f32 %v5348_v60  ;;  %v2989_v47 = vrot.slane %v5348_v60, 6 }
0x296e   :  { %v3089_v1 = vpop.permute.xlu1 %3088 }
0x296f   :  { %4167 = vmatmul.mubr.msk.f32.vlgmr.msra.gmra.mrb[26].mxu0 %vm257_vm6, %v3089_v1  ;;  %v3439_v1 = vld [vmem:[%s5467_s15 + $0x8] sm:$0xff] }
0x2970   :  { %4394 = vmatpush3.bf16.msra.mxu0 %v4393_v61  ;;  %4177 = vmatprep.mubr.msk.f32.mxu0 %vm4632_vm2, %v4633_v17 }
0x2971   :  { %4395 = vmatprep.subr.bf16.mxu0 %v4631_v14 }
0x2974   :  { %4397 = vmatpush3.bf16.msra.mxu0 %v4396_v29  ;;  %v4411_v29 = vpack.c.bf16 %v3439_v1, %v3438_v62 }
0x2975   :  { %4416 = vmatprep.subr.bf16.mxu0 %v4631_v14 }
0x2977   :  { %v4614_v5 = vpop.eup %4613  ;;  %4178 = vmatmul.mubr.f32.vlgmr.msra.gmra.mrb[26].mxu0 %v4633_v17 }
0x2978   :  { %2896 = vrot.lane.b32.xlu0 %v4614_v5, %s4634_s3  ;;  %4217 = vmatprep.mubr.msk.f32.mxu0 %vm4632_vm2, %v4633_v17  ;;  %v3440_v5 = vld [vmem:[%s5467_s15 + $0x10] sm:$0xff] }
0x29ea   :  { %v2897_v8 = vpop.permute.xlu0 %2896 }
0x29eb   :  { %v2899_v26 = vmul.f32 %v2897_v8, %v2879_v50 }
0x29ed   :  { %v2901_v59 = vrot.slane %v2899_v26, 4 }
0x29ef   :  { %2902 = vrot.lane.b32.xlu0 %v2901_v59, %s4635_s6  ;;  %v3675_v59 = vld [vmem:[%s5468_s14] ss:$0 sm:$0xff] }
0x2a4a   :  { %v3240_v7 = vpop.f32.mrb[26].mxu0 }
0x2a4b   :  { %v4419_v4 = vadd.f32 %v3671_v19, %v3240_v7  ;;  %v4179_v9 = vpop.f32.mrb[27].mxu0 }
0x2a4d   :  { %v3672_v11 = vmul.f32 -1.442695, %v4419_v4 }
0x2a4f   :  { %4615 = vpow2.f32 %v3672_v11  ;;  %v3524_v11 = vld [vmem:[%s5469_s17 + $0x8] sm:$0xff] }
0x2a50   :  { %4617 = vtanh.f32 %v4419_v4 }
0x2a59   :  { %v4616_v37 = vpop.eup %4615 }
0x2a5a   :  { %v3249_v58 = vadd.f32 1.0, %v4616_v37  ;;  %v4618_v13 = vpop.eup %4617 }
0x2a5c   :  { %4619 = vrcp.f32 %v3249_v58  ;;  %v3676_v58 = vld [vmem:[%s5470_s16] ss:$0 sm:$0xff] }
0x2a61   :  { %v2903_v12 = vpop.permute.xlu0 %2902 }
0x2a62   :  { %4145 = vmatmul.mubr.msk.f32.vlgmr.msra.gmra.mrb[26].mxu1 %vm257_vm6, %v2903_v12 }
0x2a63   :  { %4188 = vmatprep.mubr.msk.f32.mxu1 %vm4632_vm2, %v4633_v17 }
0x2a66   :  { %v4620_v0 = vpop.eup %4619 }
0x2a67   :  { %v3252_v10 = vsel %vm4832_vm5, %v4618_v13, %v4620_v0 }
0x2a68   :  { %3255 = vrot.lane.b32.xlu1 %v3252_v10, %s4634_s3  ;;  %v3253_v32 = vmul.f32 0.0, %v3252_v10 }
0x2ada   :  { %v3256_v18 = vpop.permute.xlu1 %3255 }
0x2adb   :  { %v3258_v20 = vmul.f32 %v3256_v18, %v3252_v10  ;;  %v3678_v18 = vld [vmem:[%s5471_s18] ss:$0 sm:$0xff] }
0x2add   :  { %3260 = vrot.lane.b32.xlu1 %v3258_v20, %s4635_s6 }
0x2b35   :  { %v2972_v25 = vpop.f32.mrb[26].mxu1 }
0x2b36   :  { %v2977_v28 = vrot.slane %v2972_v25, 2  ;;  %v4146_v23 = vpop.f32.mrb[27].mxu1 }
0x2b38   :  { %v2979_v6 = vadd.f32 %v2977_v28, %v5219_v21  ;;  %v3274_v21 = vld [vmem:[%s5466_s13 + $0x20] sm:$0xff] }
0x2b39   :  { %v4399_v40 = vpack.c.bf16 %v3275_v39, %v3274_v21 }
0x2b3a   :  { %v3668_v30 = vmul.f32 -1.442695, %v2979_v6 }
0x2b3b   :  { %4400 = vmatpush3.bf16.msra.mxu1 %v4399_v40 }
0x2b3c   :  { %4621 = vpow2.f32 %v3668_v30  ;;  %4401 = vmatprep.subr.bf16.mxu1 %v4631_v14 }
0x2b3d   :  { %4623 = vtanh.f32 %v2979_v6 }
0x2b3f   :  { %4403 = vmatpush3.bf16.msra.mxu1 %v4402_v43 }
0x2b40   :  { %4404 = vmatprep.subr.bf16.mxu1 %v4631_v14 }
0x2b46   :  { %v4622_v31 = vpop.eup %4621 }
0x2b47   :  { %v2984_v24 = vadd.f32 1.0, %v4622_v31  ;;  %v4624_v15 = vpop.eup %4623 }
0x2b49   :  { %4625 = vrcp.f32 %v2984_v24 }
0x2b4f   :  { %v3261_v16 = vpop.permute.xlu1 %3260 }
0x2b50   :  { %v3263_v34 = vadd.f32 %v3261_v16, %v3253_v32 }
0x2b52   :  { %4627 = vtanh.f32 %v3263_v34 }
0x2b53   :  { %v4626_v35 = vpop.eup %4625 }
0x2b54   :  { %v2987_v36 = vsel %vm4832_vm5, %v4624_v15, %v4626_v35 }
0x2b55   :  { %2993 = vrot.lane.b32.xlu0 %v2987_v36, %s4634_s3  ;;  %v2991_v48 = vmul.f32 %v2989_v47, %v2987_v36 }
0x2b5c   :  { %v4628_v38 = vpop.eup %4627 }
0x2b5d   :  { %3266 = vrot.lane.b32.xlu1 %v4628_v38, %s4634_s3 }
0x2bc7   :  { %v2994_v27 = vpop.permute.xlu0 %2993 }
0x2bc8   :  { %v2996_v44 = vmul.f32 %v2994_v27, %v2987_v36 }
0x2bca   :  { %2998 = vrot.lane.b32.xlu0 %v2996_v44, %s4635_s6 }
0x2bcf   :  { %v3267_v46 = vpop.permute.xlu1 %3266 }
0x2bd0   :  { %v3269_v3 = vmul.f32 %v3267_v46, %v3252_v10 }
0x2bd2   :  { %3279 = vrot.lane.b32.xlu1 %v3269_v3, %s4635_s6 }
0x2c3c   :  { %v2999_v49 = vpop.permute.xlu0 %2998 }
0x2c3d   :  { %v3001_v50 = vadd.f32 %v2999_v49, %v2991_v48 }
0x2c3f   :  { %4629 = vtanh.f32 %v3001_v50 }
0x2c44   :  { %v3280_v52 = vpop.permute.xlu1 %3279 }
0x2c45   :  { %4189 = vmatmul.mubr.msk.f32.vlgmr.msra.gmra.mrb[28].mxu1 %vm257_vm6, %v3280_v52 }
0x2c46   :  { %4199 = vmatprep.mubr.msk.f32.mxu1 %vm4632_vm2, %v4633_v17  ;;  %4406 = vmatpush3.bf16.msra.mxu1 %v4405_v56 }
0x2c47   :  { %4407 = vmatprep.subr.bf16.mxu1 %v4631_v14 }
0x2c49   :  { %v4630_v2 = vpop.eup %4629 }
0x2c4a   :  { %3004 = vrot.lane.b32.xlu0 %v4630_v2, %s4634_s3  ;;  %4409 = vmatpush3.bf16.msra.mxu1 %v4408_v42 }
0x2c4b   :  { %4410 = vmatprep.subr.bf16.mxu1 %v4631_v14 }
0x2cbc   :  { %v3005_v33 = vpop.permute.xlu0 %3004 }
0x2cbd   :  { %v3007_v51 = vmul.f32 %v3005_v33, %v2987_v36 }
0x2cbf   :  { %v3354_v63 = vrot.slane %v3007_v51, 6 }
0x2cc1   :  { %3355 = vrot.lane.b32.xlu0 %v3354_v63, %s4635_s6 }
0x2d18   :  { %v3349_v60 = vpop.f32.mrb[28].mxu1 }
0x2d19   :  { %v4190_v61 = vpop.f32.mrb[29].mxu1 }
0x2d33   :  { %v3356_v22 = vpop.permute.xlu0 %3355 }
0x2d34   :  { %4200 = vmatmul.mubr.msk.f32.vlgmr.msra.gmra.mrb[30].mxu1 %vm257_vm6, %v3356_v22 }
0x2d35   :  { %4210 = vmatprep.mubr.msk.f32.mxu1 %vm4632_vm2, %v4633_v17  ;;  %4412 = vmatpush3.bf16.msra.mxu1 %v4411_v29  ;;  %v3441_v17 = vld [vmem:[%s5467_s15 + $0x18] sm:$0xff] }
0x2d36   :  { %4413 = vmatprep.subr.bf16.mxu1 %v4631_v14  ;;  %v4414_v8 = vpack.c.bf16 %v3441_v17, %v3440_v5  ;;  %v3523_v14 = vld [vmem:[%s5469_s17] sm:$0xff] }
0x2d37   :  { %v4417_v37 = vpack.c.bf16 %v3524_v11, %v3523_v14 }
0x2d39   :  { %4415 = vmatpush3.bf16.msra.mxu1 %v4414_v8  ;;  %4418 = vmatpush3.bf16.msra.mxu0 %v4417_v37 }
0x2e07   :  { %v3425_v26 = vpop.f32.mrb[30].mxu1 }
0x2e08   :  { %v3426_v19 = vadd.f32 %v3425_v26, %v3349_v60  ;;  %v4201_v7 = vpop.f32.mrb[31].mxu1 }
0x2e0a   :  { %v3436_v4 = vadd.f32 %v3675_v59, %v3426_v19 }
0x2e0c   :  { %v3437_v9 = vmax.f32 %v3436_v4, 0.0 }
0x2e0e   :  { %4211 = vmatmul.mubr.msk.f32.vlgmr.msra.gmra.mrb[32].mxu1 %vm257_vm6, %v3437_v9 }
0x2ee1   :  { %v3518_v12 = vpop.f32.mrb[32].mxu1 }
0x2ee2   :  { %v3519_v13 = vadd.f32 %v3676_v58, %v3518_v12  ;;  %v4212_v0 = vpop.f32.mrb[33].mxu1 }
0x2ee4   :  { %v3522_v10 = vmax.f32 %v3519_v13, 0.0 }
0x2ee6   :  { %4218 = vmatmul.mubr.msk.f32.vlgmr.msra.gmra.mrb[28].mxu0 %vm3532_vm9, %v3522_v10 }
0x2fb9   :  { %v3602_v20 = vpop.f32.mrb[28].mxu0 }
0x2fba   :  { %v3603_v25 = vadd.f32 %v3678_v18, %v3602_v20  ;;  %v4219_v28 = vpop.f32.mrb[29].mxu0 }
0x2fbc   :  { %3606 = vst [vmem:[%s5472_s19] sm:$0x3] %v3603_v25 }

</bundles_post_ra>
